<compile_context>
chip_gen: v6e
topology: v6e:2x2x1
jax: 0.10.0
libtpu: 0.0.40
codegen_flags: <defaults>
</compile_context>

<pallas_src>
import jax
import jax.numpy as jnp
import numpy as np
from jax.experimental import pallas as pl
from jax.experimental.pallas import tpu as pltpu

DTYPE_MXU = jnp.bfloat16   # MXU input dtype; accumulation stays f32


def basic_block_kernel(x_ref, w1_ref, b1_ref, w2_ref, b2_ref, o_ref, xpad_ref):
    # x_ref   : (1, H, W, C)  f32   full input image (resident across row tiles)
    # w*_ref  : (9*C, C)      bf16  conv weights, BN scale folded, taps in K
    # b*_ref  : (1, C)        f32   folded BN bias
    # o_ref   : (1, TH, W, C) f32   output row tile
    # xpad_ref: (H+4, W+2, C) bf16  input with 2-row / 1-col zero halo
    _, H, W, C = x_ref.shape
    TH = o_ref.shape[1]
    rt = pl.program_id(1)
    r0 = pl.multiple_of(rt * TH, TH)           # first output row of this tile

    # ---- stage the image into the zero-halo scratch once per image.
    # The row axis is "arbitrary" (sequential per image), so rt==0 runs first.
    @pl.when(rt == 0)
    def _():
        zr = jnp.zeros((2, W + 2, C), DTYPE_MXU)
        zc = jnp.zeros((H + 4, 1, C), DTYPE_MXU)
        xpad_ref[0:2, :, :] = zr
        xpad_ref[H + 2:H + 4, :, :] = zr
        xpad_ref[:, 0:1, :] = zc
        xpad_ref[:, W + 1:W + 2, :] = zc
        xpad_ref[2:H + 2, 1:W + 1, :] = x_ref[0].astype(DTYPE_MXU)

    single_dot = (3 * C <= 256)   # small C: one K=9C dot fills the MXU better

    def conv3x3(get_slab, out_rows, w_ref):
        # get_slab(dy) -> (out_rows, W+2, C) bf16 slab (already zero-padded in W)
        if single_dot:
            cols = []
            for dy in range(3):
                slab = get_slab(dy)
                for dx in range(3):
                    cols.append(slab[:, dx:dx + W, :])
            strip = jnp.concatenate(cols, axis=-1).reshape(out_rows * W, 9 * C)
            return jnp.dot(strip, w_ref[...], preferred_element_type=jnp.float32)
        acc = None
        for dy in range(3):                     # 3 dots, K = 3C; dy=0 inits acc
            slab = get_slab(dy)
            strip = jnp.concatenate([slab[:, dx:dx + W, :] for dx in range(3)],
                                    axis=-1).reshape(out_rows * W, 3 * C)
            part = jnp.dot(strip, w_ref[dy * 3 * C:(dy + 1) * 3 * C, :],
                           preferred_element_type=jnp.float32)
            acc = part if acc is None else acc + part
        return acc

    # ---- conv1 (BN1 folded) + bias + ReLU on TH+2 rows (1-row vertical halo
    # for conv2).  xpad rows r0 .. r0+TH+3 are always in bounds (2-row halo).
    acc1 = conv3x3(lambda dy: xpad_ref[pl.ds(r0 + dy, TH + 2), :, :],
                   TH + 2, w1_ref)
    y = jnp.maximum(acc1.reshape(TH + 2, W, C) + b1_ref[...], 0.0)
    # Rows outside the image must act as conv2's zero padding, not ReLU(bias).
    arow = r0 - 1 + jax.lax.broadcasted_iota(jnp.int32, (TH + 2, 1, 1), 0)
    y = jnp.where((arow >= 0) & (arow < H), y, 0.0)

    # ---- conv2 taps built in-register: zero-pad columns of y via concat.
    zc = jnp.zeros((TH + 2, 1, C), DTYPE_MXU)
    y_wpad = jnp.concatenate([zc, y.astype(DTYPE_MXU), zc], axis=1)  # (TH+2,W+2,C)

    # ---- conv2 (BN2 folded) + bias + residual + ReLU
    acc2 = conv3x3(lambda dy: y_wpad[dy:dy + TH, :, :], TH, w2_ref)
    z = acc2.reshape(1, TH, W, C) + b2_ref[...]
    resid = x_ref[:, pl.ds(r0, TH), :, :]        # f32 identity rows (re-read)
    o_ref[...] = jnp.maximum(z + resid, 0.0).astype(o_ref.dtype)


def _fold_bn_into_conv(w, gamma, beta, mean, var, eps):
    """Fold eval-mode BN into conv: returns ((9*Cin, C) bf16 weight, (1, C) f32 bias)."""
    scale = gamma / jnp.sqrt(var + eps)
    bias = beta - mean * scale
    kh, kw, ci, co = w.shape
    w_folded = (w * scale[None, None, None, :]).reshape(kh * kw * ci, co)
    return w_folded.astype(DTYPE_MXU), bias.reshape(1, co).astype(jnp.float32)


def _pick_row_tile(H):
    """Row tile of ~8-16 rows dividing H; fall back to the full image."""
    for th in (16, 12, 8, 14, 10, 6, 4, 7, 5, 3, 2):
        if H % th == 0 and th < H:
            return th
    return H


def _vmem_need_bytes(H, W, C, TH):
    f32, bf16 = 4, 2
    kdim = 9 * C if 3 * C <= 256 else 3 * C
    rows1 = TH + 2
    return (
        2 * H * W * C * f32                      # input image block (double-buffered)
        + 2 * TH * W * C * f32                   # output row tile (double-buffered)
        + (H + 4) * (W + 2) * C * bf16           # zero-halo input scratch
        + 2 * rows1 * W * kdim * bf16            # conv1 strip + live concat pieces
        + 2 * TH * W * kdim * bf16               # conv2 strip + live concat pieces
        + rows1 * (W + 2) * C * (f32 + bf16)     # conv1 act (f32) + bf16 W-padded copy
        + 3 * TH * W * C * f32                   # conv2 acc, residual reload, out temp
        + 2 * 2 * 9 * C * C * bf16               # both folded weights (double-buffered)
        + 2 * 4 * C * f32                        # biases
    )


def _vmem_limit_bytes(need_bytes):
    default_scoped = 16 * 1024 * 1024            # most conservative default (v5e)
    if need_bytes <= default_scoped:
        return None
    try:
        phys = pltpu.get_tpu_info().vmem_capacity_bytes
    except Exception:
        phys = 64 * 1024 * 1024                  # v7x physical; safe lower bound
    return min(int(need_bytes * 5) // 4, int(phys * 3) // 4)


def basic_block_forward_nhwc(x_nhwc, params, eps=1e-5):
    """Preferred entry point: NHWC in / NHWC out (no per-block transposes)."""
    N, H, W, Cin = x_nhwc.shape
    w1, w2 = params["w1"], params["w2"]
    C = w1.shape[-1]
    assert Cin == C, "stride=1 / no-downsample BasicBlock requires in_planes == planes"

    w1f, b1 = _fold_bn_into_conv(w1, params["g1"], params["b1"],
                                 params["m1"], params["v1"], eps)
    w2f, b2 = _fold_bn_into_conv(w2, params["g2"], params["b2"],
                                 params["m2"], params["v2"], eps)

    TH = _pick_row_tile(H)
    n_rt = H // TH
    need = _vmem_need_bytes(H, W, C, TH)

    return pl.pallas_call(
        basic_block_kernel,
        out_shape=jax.ShapeDtypeStruct((N, H, W, C), x_nhwc.dtype),
        grid_spec=pltpu.PrefetchScalarGridSpec(
            num_scalar_prefetch=0,
            grid=(N, n_rt),                      # batch outer, row tiles inner
            in_specs=[
                pl.BlockSpec((1, H, W, C), lambda n, r: (n, 0, 0, 0)),
                pl.BlockSpec((9 * C, C),   lambda n, r: (0, 0)),
                pl.BlockSpec((1, C),       lambda n, r: (0, 0)),
                pl.BlockSpec((9 * C, C),   lambda n, r: (0, 0)),
                pl.BlockSpec((1, C),       lambda n, r: (0, 0)),
            ],
            out_specs=pl.BlockSpec((1, TH, W, C), lambda n, r: (n, r, 0, 0)),
            scratch_shapes=[pltpu.VMEM((H + 4, W + 2, C), DTYPE_MXU)],
        ),
        compiler_params=pltpu.CompilerParams(
            dimension_semantics=("parallel", "arbitrary"),
            vmem_limit_bytes=_vmem_limit_bytes(need)),
    )(x_nhwc, w1f, b1, w2f, b2)


def basic_block_forward(x_nchw, params, eps=1e-5):
    """PyTorch-convention wrapper (NCHW).  In a full network, call
    basic_block_forward_nhwc directly to keep activations NHWC end-to-end."""
    x = jnp.transpose(x_nchw, (0, 2, 3, 1))
    out = basic_block_forward_nhwc(x, params, eps)
    return jnp.transpose(out, (0, 3, 1, 2))


def reference_forward(x_nchw, params, eps=1e-5):
    """Pure-JAX f32 reference (XLA conv) mirroring the PyTorch eval forward."""
    x = jnp.transpose(x_nchw, (0, 2, 3, 1))
    def conv(v, w):
        return jax.lax.conv_general_dilated(
            v, w, window_strides=(1, 1), padding=((1, 1), (1, 1)),
            dimension_numbers=("NHWC", "HWIO", "NHWC"))
    def bn(v, g, b, m, var):
        return (v - m) * (g / jnp.sqrt(var + eps)) + b
    y = jax.nn.relu(bn(conv(x, params["w1"]),
                       params["g1"], params["b1"], params["m1"], params["v1"]))
    z = bn(conv(y, params["w2"]),
           params["g2"], params["b2"], params["m2"], params["v2"])
    out = jax.nn.relu(z + x)
    return jnp.transpose(out, (0, 3, 1, 2))


if __name__ == "__main__":
    key = jax.random.PRNGKey(0)
    N, Cin, H, W = 2, 4, 16, 16
    planes = Cin                      # expansion=1, stride=1, no downsample
    ks = jax.random.split(key, 12)

    params = {
        "w1": 0.1 * jax.random.normal(ks[0], (3, 3, Cin, planes), jnp.float32),
        "g1": 1.0 + 0.1 * jax.random.normal(ks[1], (planes,), jnp.float32),
        "b1": 0.1 * jax.random.normal(ks[2], (planes,), jnp.float32),
        "m1": 0.1 * jax.random.normal(ks[3], (planes,), jnp.float32),
        "v1": 0.5 + 0.5 * jnp.abs(jax.random.normal(ks[4], (planes,), jnp.float32)),
        "w2": 0.1 * jax.random.normal(ks[5], (3, 3, planes, planes), jnp.float32),
        "g2": 1.0 + 0.1 * jax.random.normal(ks[6], (planes,), jnp.float32),
        "b2": 0.1 * jax.random.normal(ks[7], (planes,), jnp.float32),
        "m2": 0.1 * jax.random.normal(ks[8], (planes,), jnp.float32),
        "v2": 0.5 + 0.5 * jnp.abs(jax.random.normal(ks[9], (planes,), jnp.float32)),
    }
    x = jax.random.normal(ks[11], (N, Cin, H, W), jnp.float32)

    out = jax.block_until_ready(basic_block_forward(x, params))
    ref = jax.block_until_ready(reference_forward(x, params))
    # bf16 MXU inputs vs f32 reference -> loosened tolerance (expected precision
    # change, not a bug).
    np.testing.assert_allclose(np.asarray(out), np.asarray(ref),
                               rtol=2e-2, atol=2e-2)
    print("KERNEL_OK")
</pallas_src>

<mosaic_0001>
module attributes {stable_mosaic.version = 11 : i64} {
  func.func @basic_block_kernel(%arg0: i32, %arg1: i32, %arg2: memref<1x16x16x4xf32, #tpu.memory_space<vmem>>, %arg3: memref<36x4xbf16, #tpu.memory_space<vmem>>, %arg4: memref<1x4xf32, #tpu.memory_space<vmem>>, %arg5: memref<36x4xbf16, #tpu.memory_space<vmem>>, %arg6: memref<1x4xf32, #tpu.memory_space<vmem>>, %arg7: memref<1x8x16x4xf32, #tpu.memory_space<vmem>>, %arg8: memref<20x18x4xbf16, #tpu.memory_space<vmem>>) attributes {dimension_semantics = [#tpu.dimension_semantics<parallel>, #tpu.dimension_semantics<arbitrary>], iteration_bounds = array<i64: 2, 2>, scalar_prefetch = 0 : i64, scratch_operands = 1 : i64, tpu.core_type = #tpu.core_type<tc>, window_params = [{transform_indices = @transform_0, window_bounds = array<i64: 1, 16, 16, 4>}, {pipeline_mode = #tpu.pipeline_mode<synchronous>, transform_indices = @transform_1, window_bounds = array<i64: 36, 4>}, {pipeline_mode = #tpu.pipeline_mode<synchronous>, transform_indices = @transform_2, window_bounds = array<i64: 1, 4>}, {pipeline_mode = #tpu.pipeline_mode<synchronous>, transform_indices = @transform_3, window_bounds = array<i64: 36, 4>}, {pipeline_mode = #tpu.pipeline_mode<synchronous>, transform_indices = @transform_4, window_bounds = array<i64: 1, 4>}, {transform_indices = @transform_5, window_bounds = array<i64: 1, 8, 16, 4>}]} {
    %c8_i32 = arith.constant 8 : i32
    %0 = arith.muli %arg1, %c8_i32 : i32
    %1 = tpu.assume_multiple %0, 8 : i32
    %c0_i32 = arith.constant 0 : i32
    %2 = arith.cmpi eq, %arg1, %c0_i32 : i32
    %3 = arith.extui %2 : i1 to i32
    %c0_i32_0 = arith.constant 0 : i32
    %4 = arith.cmpi ne, %3, %c0_i32_0 : i32
    scf.if %4 {
      %cst_29 = arith.constant 0.000000e+00 : bf16
      %77 = vector.broadcast %cst_29 : bf16 to vector<2x18x4xbf16>
      %cst_30 = arith.constant 0.000000e+00 : bf16
      %78 = vector.broadcast %cst_30 : bf16 to vector<20x1x4xbf16>
      %c0_31 = arith.constant 0 : index
      %c0_32 = arith.constant 0 : index
      %c0_33 = arith.constant 0 : index
      %79 = vector.load %arg8[%c0_31, %c0_32, %c0_33] : memref<20x18x4xbf16, #tpu.memory_space<vmem>>, vector<2x18x4xbf16>
      tpu.vector_store %arg8[%c0_31, %c0_32, %c0_33], %77 {strides = array<i32>} : memref<20x18x4xbf16, #tpu.memory_space<vmem>>, vector<2x18x4xbf16>,
      %c18 = arith.constant 18 : index
      %c0_34 = arith.constant 0 : index
      %c0_35 = arith.constant 0 : index
      %80 = vector.load %arg8[%c18, %c0_34, %c0_35] : memref<20x18x4xbf16, #tpu.memory_space<vmem>>, vector<2x18x4xbf16>
      tpu.vector_store %arg8[%c18, %c0_34, %c0_35], %77 {strides = array<i32>} : memref<20x18x4xbf16, #tpu.memory_space<vmem>>, vector<2x18x4xbf16>,
      %c0_36 = arith.constant 0 : index
      %c0_37 = arith.constant 0 : index
      %c0_38 = arith.constant 0 : index
      %81 = vector.load %arg8[%c0_36, %c0_37, %c0_38] : memref<20x18x4xbf16, #tpu.memory_space<vmem>>, vector<20x1x4xbf16>
      tpu.vector_store %arg8[%c0_36, %c0_37, %c0_38], %78 {strides = array<i32>} : memref<20x18x4xbf16, #tpu.memory_space<vmem>>, vector<20x1x4xbf16>,
      %c0_39 = arith.constant 0 : index
      %c17 = arith.constant 17 : index
      %c0_40 = arith.constant 0 : index
      %82 = vector.load %arg8[%c0_39, %c17, %c0_40] : memref<20x18x4xbf16, #tpu.memory_space<vmem>>, vector<20x1x4xbf16>
      tpu.vector_store %arg8[%c0_39, %c17, %c0_40], %78 {strides = array<i32>} : memref<20x18x4xbf16, #tpu.memory_space<vmem>>, vector<20x1x4xbf16>,
      %c0_41 = arith.constant 0 : index
      %c0_42 = arith.constant 0 : index
      %c0_43 = arith.constant 0 : index
      %c0_44 = arith.constant 0 : index
      %83 = vector.load %arg2[%c0_41, %c0_42, %c0_43, %c0_44] : memref<1x16x16x4xf32, #tpu.memory_space<vmem>>, vector<1x16x16x4xf32>
      %84 = vector.shape_cast %83 : vector<1x16x16x4xf32> to vector<16x16x4xf32>
      %85 = arith.truncf %84 : vector<16x16x4xf32> to vector<16x16x4xbf16>
      %c2 = arith.constant 2 : index
      %c1 = arith.constant 1 : index
      %c0_45 = arith.constant 0 : index
      %86 = vector.load %arg8[%c2, %c1, %c0_45] : memref<20x18x4xbf16, #tpu.memory_space<vmem>>, vector<16x16x4xbf16>
      tpu.vector_store %arg8[%c2, %c1, %c0_45], %85 {strides = array<i32>} : memref<20x18x4xbf16, #tpu.memory_space<vmem>>, vector<16x16x4xbf16>,
    } else {
    }
    %c0_i32_1 = arith.constant 0 : i32
    %5 = arith.addi %1, %c0_i32_1 : i32
    %6 = arith.index_cast %5 : i32 to index
    %c0 = arith.constant 0 : index
    %c0_2 = arith.constant 0 : index
    %7 = vector.load %arg8[%6, %c0, %c0_2] : memref<20x18x4xbf16, #tpu.memory_space<vmem>>, vector<10x18x4xbf16>
    %8 = vector.extract_strided_slice %7 {offsets = [0, 0, 0], sizes = [10, 16, 4], strides = [1, 1, 1]} : vector<10x18x4xbf16> to vector<10x16x4xbf16>
    %9 = vector.extract_strided_slice %7 {offsets = [0, 1, 0], sizes = [10, 16, 4], strides = [1, 1, 1]} : vector<10x18x4xbf16> to vector<10x16x4xbf16>
    %10 = vector.extract_strided_slice %7 {offsets = [0, 2, 0], sizes = [10, 16, 4], strides = [1, 1, 1]} : vector<10x18x4xbf16> to vector<10x16x4xbf16>
    %c1_i32 = arith.constant 1 : i32
    %11 = arith.addi %1, %c1_i32 : i32
    %12 = arith.index_cast %11 : i32 to index
    %c0_3 = arith.constant 0 : index
    %c0_4 = arith.constant 0 : index
    %13 = vector.load %arg8[%12, %c0_3, %c0_4] : memref<20x18x4xbf16, #tpu.memory_space<vmem>>, vector<10x18x4xbf16>
    %14 = vector.extract_strided_slice %13 {offsets = [0, 0, 0], sizes = [10, 16, 4], strides = [1, 1, 1]} : vector<10x18x4xbf16> to vector<10x16x4xbf16>
    %15 = vector.extract_strided_slice %13 {offsets = [0, 1, 0], sizes = [10, 16, 4], strides = [1, 1, 1]} : vector<10x18x4xbf16> to vector<10x16x4xbf16>
    %16 = vector.extract_strided_slice %13 {offsets = [0, 2, 0], sizes = [10, 16, 4], strides = [1, 1, 1]} : vector<10x18x4xbf16> to vector<10x16x4xbf16>
    %c2_i32 = arith.constant 2 : i32
    %17 = arith.addi %1, %c2_i32 : i32
    %18 = arith.index_cast %17 : i32 to index
    %c0_5 = arith.constant 0 : index
    %c0_6 = arith.constant 0 : index
    %19 = vector.load %arg8[%18, %c0_5, %c0_6] : memref<20x18x4xbf16, #tpu.memory_space<vmem>>, vector<10x18x4xbf16>
    %20 = vector.extract_strided_slice %19 {offsets = [0, 0, 0], sizes = [10, 16, 4], strides = [1, 1, 1]} : vector<10x18x4xbf16> to vector<10x16x4xbf16>
    %21 = vector.extract_strided_slice %19 {offsets = [0, 1, 0], sizes = [10, 16, 4], strides = [1, 1, 1]} : vector<10x18x4xbf16> to vector<10x16x4xbf16>
    %22 = vector.extract_strided_slice %19 {offsets = [0, 2, 0], sizes = [10, 16, 4], strides = [1, 1, 1]} : vector<10x18x4xbf16> to vector<10x16x4xbf16>
    %23 = tpu.concatenate %8, %9, %10, %14, %15, %16, %20, %21, %22 in 2 : vector<10x16x4xbf16>, vector<10x16x4xbf16>, vector<10x16x4xbf16>, vector<10x16x4xbf16>, vector<10x16x4xbf16>, vector<10x16x4xbf16>, vector<10x16x4xbf16>, vector<10x16x4xbf16>, vector<10x16x4xbf16> -> vector<10x16x36xbf16>
    %24 = vector.shape_cast %23 : vector<10x16x36xbf16> to vector<160x36xbf16>
    %c0_7 = arith.constant 0 : index
    %c0_8 = arith.constant 0 : index
    %25 = vector.load %arg3[%c0_7, %c0_8] : memref<36x4xbf16, #tpu.memory_space<vmem>>, vector<36x4xbf16>
    %cst = arith.constant dense<0.000000e+00> : vector<160x4xf32>
    %26 = tpu.matmul %24, %25, %cst {dimension_numbers = #tpu.dot_dimension_numbers<[1], [0], [0], [1], [0, 0, 1, 1], [], []>} : vector<160x36xbf16>, vector<36x4xbf16>, vector<160x4xf32> -> vector<160x4xf32>
    %27 = vector.shape_cast %26 : vector<160x4xf32> to vector<10x16x4xf32>
    %c0_9 = arith.constant 0 : index
    %c0_10 = arith.constant 0 : index
    %28 = vector.load %arg4[%c0_9, %c0_10] : memref<1x4xf32, #tpu.memory_space<vmem>>, vector<1x4xf32>
    %29 = vector.shape_cast %28 : vector<1x4xf32> to vector<1x1x4xf32>
    %30 = vector.broadcast %29 : vector<1x1x4xf32> to vector<10x16x4xf32>
    %31 = arith.addf %27, %30 : vector<10x16x4xf32>
    %cst_11 = arith.constant 0.000000e+00 : f32
    %32 = vector.broadcast %cst_11 : f32 to vector<10x16x4xf32>
    %33 = arith.maximumf %31, %32 : vector<10x16x4xf32>
    %c1_i32_12 = arith.constant 1 : i32
    %34 = arith.subi %1, %c1_i32_12 : i32
    %35 = tpu.iota {dimensions = array<i32: 0>} : vector<10x1x1xi32>
    %36 = vector.broadcast %34 : i32 to vector<10x1x1xi32>
    %37 = arith.addi %36, %35 : vector<10x1x1xi32>
    %c0_i32_13 = arith.constant 0 : i32
    %38 = vector.broadcast %c0_i32_13 : i32 to vector<10x1x1xi32>
    %39 = arith.cmpi sge, %37, %38 : vector<10x1x1xi32>
    %c16_i32 = arith.constant 16 : i32
    %40 = vector.broadcast %c16_i32 : i32 to vector<10x1x1xi32>
    %41 = arith.cmpi slt, %37, %40 : vector<10x1x1xi32>
    %42 = arith.andi %39, %41 : vector<10x1x1xi1>
    %cst_14 = arith.constant 0.000000e+00 : f32
    %43 = vector.shape_cast %42 : vector<10x1x1xi1> to vector<10x1x1xi1>
    %44 = vector.broadcast %43 : vector<10x1x1xi1> to vector<10x16x4xi1>
    %45 = vector.broadcast %cst_14 : f32 to vector<10x16x4xf32>
    %46 = arith.select %44, %33, %45 : vector<10x16x4xi1>, vector<10x16x4xf32>
    %cst_15 = arith.constant 0.000000e+00 : bf16
    %47 = vector.broadcast %cst_15 : bf16 to vector<10x1x4xbf16>
    %48 = arith.truncf %46 : vector<10x16x4xf32> to vector<10x16x4xbf16>
    %49 = tpu.concatenate %47, %48, %47 in 1 : vector<10x1x4xbf16>, vector<10x16x4xbf16>, vector<10x1x4xbf16> -> vector<10x18x4xbf16>
    %50 = vector.extract_strided_slice %49 {offsets = [0, 0, 0], sizes = [8, 18, 4], strides = [1, 1, 1]} : vector<10x18x4xbf16> to vector<8x18x4xbf16>
    %51 = vector.extract_strided_slice %50 {offsets = [0, 0, 0], sizes = [8, 16, 4], strides = [1, 1, 1]} : vector<8x18x4xbf16> to vector<8x16x4xbf16>
    %52 = vector.extract_strided_slice %50 {offsets = [0, 1, 0], sizes = [8, 16, 4], strides = [1, 1, 1]} : vector<8x18x4xbf16> to vector<8x16x4xbf16>
    %53 = vector.extract_strided_slice %50 {offsets = [0, 2, 0], sizes = [8, 16, 4], strides = [1, 1, 1]} : vector<8x18x4xbf16> to vector<8x16x4xbf16>
    %54 = vector.extract_strided_slice %49 {offsets = [1, 0, 0], sizes = [8, 18, 4], strides = [1, 1, 1]} : vector<10x18x4xbf16> to vector<8x18x4xbf16>
    %55 = vector.extract_strided_slice %54 {offsets = [0, 0, 0], sizes = [8, 16, 4], strides = [1, 1, 1]} : vector<8x18x4xbf16> to vector<8x16x4xbf16>
    %56 = vector.extract_strided_slice %54 {offsets = [0, 1, 0], sizes = [8, 16, 4], strides = [1, 1, 1]} : vector<8x18x4xbf16> to vector<8x16x4xbf16>
    %57 = vector.extract_strided_slice %54 {offsets = [0, 2, 0], sizes = [8, 16, 4], strides = [1, 1, 1]} : vector<8x18x4xbf16> to vector<8x16x4xbf16>
    %58 = vector.extract_strided_slice %49 {offsets = [2, 0, 0], sizes = [8, 18, 4], strides = [1, 1, 1]} : vector<10x18x4xbf16> to vector<8x18x4xbf16>
    %59 = vector.extract_strided_slice %58 {offsets = [0, 0, 0], sizes = [8, 16, 4], strides = [1, 1, 1]} : vector<8x18x4xbf16> to vector<8x16x4xbf16>
    %60 = vector.extract_strided_slice %58 {offsets = [0, 1, 0], sizes = [8, 16, 4], strides = [1, 1, 1]} : vector<8x18x4xbf16> to vector<8x16x4xbf16>
    %61 = vector.extract_strided_slice %58 {offsets = [0, 2, 0], sizes = [8, 16, 4], strides = [1, 1, 1]} : vector<8x18x4xbf16> to vector<8x16x4xbf16>
    %62 = tpu.concatenate %51, %52, %53, %55, %56, %57, %59, %60, %61 in 2 : vector<8x16x4xbf16>, vector<8x16x4xbf16>, vector<8x16x4xbf16>, vector<8x16x4xbf16>, vector<8x16x4xbf16>, vector<8x16x4xbf16>, vector<8x16x4xbf16>, vector<8x16x4xbf16>, vector<8x16x4xbf16> -> vector<8x16x36xbf16>
    %63 = vector.shape_cast %62 : vector<8x16x36xbf16> to vector<128x36xbf16>
    %c0_16 = arith.constant 0 : index
    %c0_17 = arith.constant 0 : index
    %64 = vector.load %arg5[%c0_16, %c0_17] : memref<36x4xbf16, #tpu.memory_space<vmem>>, vector<36x4xbf16>
    %cst_18 = arith.constant dense<0.000000e+00> : vector<128x4xf32>
    %65 = tpu.matmul %63, %64, %cst_18 {dimension_numbers = #tpu.dot_dimension_numbers<[1], [0], [0], [1], [0, 0, 1, 1], [], []>} : vector<128x36xbf16>, vector<36x4xbf16>, vector<128x4xf32> -> vector<128x4xf32>
    %66 = vector.shape_cast %65 : vector<128x4xf32> to vector<1x8x16x4xf32>
    %c0_19 = arith.constant 0 : index
    %c0_20 = arith.constant 0 : index
    %67 = vector.load %arg6[%c0_19, %c0_20] : memref<1x4xf32, #tpu.memory_space<vmem>>, vector<1x4xf32>
    %68 = vector.shape_cast %67 : vector<1x4xf32> to vector<1x1x1x4xf32>
    %69 = vector.broadcast %68 : vector<1x1x1x4xf32> to vector<1x8x16x4xf32>
    %70 = arith.addf %66, %69 : vector<1x8x16x4xf32>
    %c0_21 = arith.constant 0 : index
    %71 = arith.index_cast %1 : i32 to index
    %c0_22 = arith.constant 0 : index
    %c0_23 = arith.constant 0 : index
    %72 = vector.load %arg2[%c0_21, %71, %c0_22, %c0_23] : memref<1x16x16x4xf32, #tpu.memory_space<vmem>>, vector<1x8x16x4xf32>
    %73 = arith.addf %70, %72 : vector<1x8x16x4xf32>
    %cst_24 = arith.constant 0.000000e+00 : f32
    %74 = vector.broadcast %cst_24 : f32 to vector<1x8x16x4xf32>
    %75 = arith.maximumf %73, %74 : vector<1x8x16x4xf32>
    %c0_25 = arith.constant 0 : index
    %c0_26 = arith.constant 0 : index
    %c0_27 = arith.constant 0 : index
    %c0_28 = arith.constant 0 : index
    %76 = vector.load %arg7[%c0_25, %c0_26, %c0_27, %c0_28] : memref<1x8x16x4xf32, #tpu.memory_space<vmem>>, vector<1x8x16x4xf32>
    tpu.vector_store %arg7[%c0_25, %c0_26, %c0_27, %c0_28], %75 {strides = array<i32>} : memref<1x8x16x4xf32, #tpu.memory_space<vmem>>, vector<1x8x16x4xf32>,
    return
  }
  func.func @transform_0(%arg0: i32, %arg1: i32) -> (i32, i32, i32, i32) {
    %c0_i32 = arith.constant 0 : i32
    %c0_i32_0 = arith.constant 0 : i32
    %c0_i32_1 = arith.constant 0 : i32
    %c0_i32_2 = arith.constant 0 : i32
    return %arg0, %c0_i32, %c0_i32_0, %c0_i32_1 : i32, i32, i32, i32
  }
  func.func @transform_1(%arg0: i32, %arg1: i32) -> (i32, i32) {
    %c0_i32 = arith.constant 0 : i32
    %c0_i32_0 = arith.constant 0 : i32
    %c0_i32_1 = arith.constant 0 : i32
    return %c0_i32, %c0_i32_0 : i32, i32
  }
  func.func @transform_2(%arg0: i32, %arg1: i32) -> (i32, i32) {
    %c0_i32 = arith.constant 0 : i32
    %c0_i32_0 = arith.constant 0 : i32
    %c0_i32_1 = arith.constant 0 : i32
    return %c0_i32, %c0_i32_0 : i32, i32
  }
  func.func @transform_3(%arg0: i32, %arg1: i32) -> (i32, i32) {
    %c0_i32 = arith.constant 0 : i32
    %c0_i32_0 = arith.constant 0 : i32
    %c0_i32_1 = arith.constant 0 : i32
    return %c0_i32, %c0_i32_0 : i32, i32
  }
  func.func @transform_4(%arg0: i32, %arg1: i32) -> (i32, i32) {
    %c0_i32 = arith.constant 0 : i32
    %c0_i32_0 = arith.constant 0 : i32
    %c0_i32_1 = arith.constant 0 : i32
    return %c0_i32, %c0_i32_0 : i32, i32
  }
  func.func @transform_5(%arg0: i32, %arg1: i32) -> (i32, i32, i32, i32) {
    %c0_i32 = arith.constant 0 : i32
    %c0_i32_0 = arith.constant 0 : i32
    %c0_i32_1 = arith.constant 0 : i32
    return %arg0, %arg1, %c0_i32, %c0_i32_0 : i32, i32, i32, i32
  }
}

</mosaic_0001>

<bundles_post_ra>
// kernel: tpu_custom_call.1
= control target key start
LH: loop header
LB: loop body
LE: loop exit
PB: predicated region body
PF: predicated region fallthrough
CT: control target
= control target key end

     0   :  { %s3750_s18 = smov 0   ;;  %s3752_s19 = smov 0   ;;  %s4962_s0 = inlined_call_operand.vmem [shape: f32[2,16,16,4], index: 0, kind: input, shape index: {}]   ;;  %s4963_s1 = inlined_call_operand.vmem [shape: bf16[36,4], index: 1, kind: input, shape index: {}]   ;;  %s4964_s2 = inlined_call_operand.vmem [shape: f32[1,4], index: 2, kind: input, shape index: {}]   ;;  %s4965_s3 = inlined_call_operand.vmem [shape: bf16[36,4], index: 3, kind: input, shape index: {}]   ;;  %s4966_s4 = inlined_call_operand.vmem [shape: f32[1,4], index: 4, kind: input, shape index: {}]   ;;  %s4967_s5 = inlined_call_operand.vmem [shape: f32[2,16,16,4], index: 5, kind: output, shape index: {}]  }
   0x1   :  { %s3754_s20 = smov 0   ;;  %s3756_s21 = smov 0  }
   0x2   :  { %s3758_s22 = smov 0  }
   0x3 LB: > { %s24_s23 = sadd.s32 1, %s3701_s20  ;;  %s27_s24 = sadd.s32 1, %s3705_s21  ;;  %s3709_s22 = sphi %s3758_s22, %s15_s22   ;;  %s3705_s21 = sphi %s3756_s21, %s5025_s21   ;;  %s3701_s20 = sphi %s3754_s20, %s5024_s20   ;;  %s3697_s19 = sphi %s3752_s19, %s5023_s19   ;;  %s3693_s18 = sphi %s3750_s18, %s5022_s18  }
   0x4   : > { %p25_p0 = scmp.ge.s32.totalorder %s24_s23, 2  ;;  %p3248_p1 = scmp.ge.s32.totalorder %s3709_s22, 1 }
   0x5   : > { %p201_p2 = scmp.lt.s32.totalorder %s3709_s22, 5 }
   0x6   : > { %s5027_s23 = smov (%p25_p0, %s24_s23), 0  ;;  %s5029_s24 = smov (!%p25_p0, %s27_s24), %s3705_s21 }
   0x7   : > { %p202_p3 = pnand %p3248_p1, %p201_p2  ;;  %p29_p4 = scmp.ge.s32.totalorder %s5029_s24, 2 }
   0x8   : > { %p234_p5 = scmp.lt.s32.totalorder (!%p202_p3), %s3697_s19, 1  ;;  %s3783_s25 = sshll.u32 (!%p202_p3), %s3693_s18, 3 }
   0x9   : > { %s5031_s24 = smov (%p29_p4, %s5029_s24), 0  ;;  %205 = sbr.rel (%p202_p3) target bundleno = 974 (0x3ce), region = 40 }
   0xa   : > { %p242_p6 = scmp.lt.s32.totalorder (!%p202_p3), %s3783_s25, 15  ;;  %p3256_p7 = scmp.ne.s32.totalorder (!%p202_p3), %s3693_s18, 0 }
   0xe   : > { %s5033_s19 = smov (!%p234_p5, %s3697_s19), 1 }
   0xf   : > { %s243_s26 = scalar_select %p242_p6, %s3783_s25, 15 }
  0x10   : > { %s3445_s27 = sshll.u32 %s5033_s19, 8  ;;  %s3253_s28 = sshll.u32 %s5033_s19, 5 }
  0x11   : > { %s3790_s6 = scalar_lea.vmem %s4962_s0, %s3445_s27  ;;  %s3252_s7 = sshll.u32 %s243_s26, 1 }
  0x12   : > { %s246_s8 = sadd.s32 %s3253_s28, %s3252_s7  ;;  %255 = sbr.rel (%p3256_p7) target bundleno = 126 (0x7e), region = 44 }
  0x13   : > { %s3254_s9 = sshll.u32 %s246_s8, 3 }
  0x14   : > { %s3795_s12 = scalar_lea.vmem %s4967_s5, %s3254_s9 }
  0x17   : > { %vm256_vm0 = vcmask 27648   ;;  %vm259_vm1 = vcmask 24576   ;;  %vm272_vm2 = vsmask.f32 256  ;;  %v3711_v0 = vmov 0   ;;  %v396_v49 = vld [vmem:[%s3790_s6] sm:$0xff] }
  0x18   : > { %257 = vst.msk [vmem:[#allocation2] sm:$0xf] %vm256_vm0, %v3711_v0  ;;  %258 = vst.msk [vmem:[#allocation2 + $0x4] sm:$0xf] %vm256_vm0, %v3711_v0  ;;  %vm334_vm4 = vsmask.f32 7938 }
  0x19   : > { %261 = vst.msk [vmem:[#allocation2 + $0xc] sm:$0xf] %vm256_vm0, %v3711_v0  ;;  %262 = vst.msk [vmem:[#allocation2 + $0x10] sm:$0xf] %vm256_vm0, %v3711_v0  ;;  %v280_v2 = vld [vmem:[#allocation2 + $0x18] sm:$0x1] }
  0x1a   : > { %265 = vst.msk [vmem:[#allocation2 + $0xd8] sm:$0xf] %vm256_vm0, %v3711_v0  ;;  %266 = vst.msk [vmem:[#allocation2 + $0xdc] sm:$0xf] %vm256_vm0, %v3711_v0  ;;  %v283_v3 = vld [vmem:[#allocation2 + $0x24] sm:$0x1] }
  0x1b   : > { %268 = vst.msk [vmem:[#allocation2 + $0xe4] sm:$0xf] %vm256_vm0, %v3711_v0  ;;  %269 = vst.msk [vmem:[#allocation2 + $0xe8] sm:$0xf] %vm256_vm0, %v3711_v0  ;;  %v286_v6 = vld [vmem:[#allocation2 + $0x30] sm:$0x1] }
  0x1c   : > { %260 = vst.msk [vmem:[#allocation2 + $0x8] sm:$0x1] %vm259_vm1, %v3711_v0  ;;  %vm3809_vm3 = vmand %vm259_vm1, %vm272_vm2  ;;  %v289_v7 = vld [vmem:[#allocation2 + $0x3c] sm:$0x1]  ;;  %v292_v10 = vld [vmem:[#allocation2 + $0x48] sm:$0x1] }
  0x1d   : > { %263 = vst.msk [vmem:[#allocation2 + $0x14] sm:$0x1] %vm259_vm1, %v3711_v0  ;;  %267 = vst.msk [vmem:[#allocation2 + $0xe0] sm:$0x1] %vm259_vm1, %v3711_v0  ;;  %v281_v4 = vsel %vm3809_vm3, 0, %v280_v2  ;;  %v284_v5 = vsel %vm3809_vm3, 0, %v283_v3 }
  0x1e   : > { %270 = vst.msk [vmem:[#allocation2 + $0xec] sm:$0x1] %vm259_vm1, %v3711_v0  ;;  %282 = vst [vmem:[#allocation2 + $0x18] sm:$0x1] %v281_v4  ;;  %v287_v8 = vsel %vm3809_vm3, 0, %v286_v6  ;;  %v290_v9 = vsel %vm3809_vm3, 0, %v289_v7  ;;  %v3446_v7 = vpack.c.bf16 %v396_v49, %v396_v49 }
  0x1f   : > { %285 = vst [vmem:[#allocation2 + $0x24] sm:$0x1] %v284_v5  ;;  %v295_v11 = vld [vmem:[#allocation2 + $0x54] sm:$0x1]  ;;  %288 = vst [vmem:[#allocation2 + $0x30] sm:$0x1] %v287_v8 }
  0x20   : > { %291 = vst [vmem:[#allocation2 + $0x3c] sm:$0x1] %v290_v9  ;;  %v293_v12 = vsel %vm3809_vm3, 0, %v292_v10  ;;  %v296_v13 = vsel %vm3809_vm3, 0, %v295_v11  ;;  %v298_v14 = vld [vmem:[#allocation2 + $0x60] sm:$0x1]  ;;  %vm3838_vm5 = vmand %vm259_vm1, %vm334_vm4 }
  0x21   : > { %v301_v15 = vld [vmem:[#allocation2 + $0x6c] sm:$0x1]  ;;  %294 = vst [vmem:[#allocation2 + $0x48] sm:$0x1] %v293_v12  ;;  %297 = vst [vmem:[#allocation2 + $0x54] sm:$0x1] %v296_v13 }
  0x22   : > { %v299_v16 = vsel %vm3809_vm3, 0, %v298_v14  ;;  %v302_v17 = vsel %vm3809_vm3, 0, %v301_v15  ;;  %v304_v18 = vld [vmem:[#allocation2 + $0x78] sm:$0x1]  ;;  %v307_v19 = vld [vmem:[#allocation2 + $0x84] sm:$0x1]  ;;  %vm3908_vm6 = vmand %vm256_vm0, %vm334_vm4 }
  0x23   : > { %300 = vst [vmem:[#allocation2 + $0x60] sm:$0x1] %v299_v16  ;;  %303 = vst [vmem:[#allocation2 + $0x6c] sm:$0x1] %v302_v17  ;;  %v305_v20 = vsel %vm3809_vm3, 0, %v304_v18  ;;  %v308_v21 = vsel %vm3809_vm3, 0, %v307_v19 }
  0x24   : > { %v310_v22 = vld [vmem:[#allocation2 + $0x90] sm:$0x1]  ;;  %v313_v23 = vld [vmem:[#allocation2 + $0x9c] sm:$0x1]  ;;  %306 = vst [vmem:[#allocation2 + $0x78] sm:$0x1] %v305_v20 }
  0x25   : > { %309 = vst [vmem:[#allocation2 + $0x84] sm:$0x1] %v308_v21  ;;  %v311_v25 = vsel %vm3809_vm3, 0, %v310_v22  ;;  %v314_v26 = vsel %vm3809_vm3, 0, %v313_v23  ;;  %v316_v27 = vld [vmem:[#allocation2 + $0xa8] sm:$0x1] }
  0x26   : > { %v319_v28 = vld [vmem:[#allocation2 + $0xb4] sm:$0x1]  ;;  %312 = vst [vmem:[#allocation2 + $0x90] sm:$0x1] %v311_v25  ;;  %315 = vst [vmem:[#allocation2 + $0x9c] sm:$0x1] %v314_v26 }
  0x27   : > { %v317_v29 = vsel %vm3809_vm3, 0, %v316_v27  ;;  %v320_v30 = vsel %vm3809_vm3, 0, %v319_v28  ;;  %v322_v31 = vld [vmem:[#allocation2 + $0xc0] sm:$0x1]  ;;  %v325_v32 = vld [vmem:[#allocation2 + $0xcc] sm:$0x1] }
  0x28   : > { %318 = vst [vmem:[#allocation2 + $0xa8] sm:$0x1] %v317_v29  ;;  %321 = vst [vmem:[#allocation2 + $0xb4] sm:$0x1] %v320_v30  ;;  %v323_v33 = vsel %vm3809_vm3, 0, %v322_v31  ;;  %v326_v34 = vsel %vm3809_vm3, 0, %v325_v32 }
  0x29   : > { %v342_v35 = vld [vmem:[#allocation2 + $0x20] sm:$0x1]  ;;  %v345_v36 = vld [vmem:[#allocation2 + $0x2c] sm:$0x1]  ;;  %324 = vst [vmem:[#allocation2 + $0xc0] sm:$0x1] %v323_v33 }
  0x2a   : > { %327 = vst [vmem:[#allocation2 + $0xcc] sm:$0x1] %v326_v34  ;;  %v343_v37 = vsel %vm3838_vm5, 0, %v342_v35  ;;  %v346_v38 = vsel %vm3838_vm5, 0, %v345_v36  ;;  %v348_v39 = vld [vmem:[#allocation2 + $0x38] sm:$0x1] }
  0x2b   : > { %v351_v40 = vld [vmem:[#allocation2 + $0x44] sm:$0x1]  ;;  %344 = vst [vmem:[#allocation2 + $0x20] sm:$0x1] %v343_v37  ;;  %347 = vst [vmem:[#allocation2 + $0x2c] sm:$0x1] %v346_v38 }
  0x2c   : > { %v349_v41 = vsel %vm3838_vm5, 0, %v348_v39  ;;  %v352_v42 = vsel %vm3838_vm5, 0, %v351_v40  ;;  %v354_v43 = vld [vmem:[#allocation2 + $0x50] sm:$0x1]  ;;  %v357_v44 = vld [vmem:[#allocation2 + $0x5c] sm:$0x1] }
  0x2d   : > { %350 = vst [vmem:[#allocation2 + $0x38] sm:$0x1] %v349_v41  ;;  %353 = vst [vmem:[#allocation2 + $0x44] sm:$0x1] %v352_v42  ;;  %v355_v45 = vsel %vm3838_vm5, 0, %v354_v43  ;;  %v358_v46 = vsel %vm3838_vm5, 0, %v357_v44 }
  0x2e   : > { %v360_v47 = vld [vmem:[#allocation2 + $0x68] sm:$0x1]  ;;  %v363_v48 = vld [vmem:[#allocation2 + $0x74] sm:$0x1]  ;;  %356 = vst [vmem:[#allocation2 + $0x50] sm:$0x1] %v355_v45 }
  0x2f   : > { %359 = vst [vmem:[#allocation2 + $0x5c] sm:$0x1] %v358_v46  ;;  %v361_v50 = vsel %vm3838_vm5, 0, %v360_v47  ;;  %v364_v51 = vsel %vm3838_vm5, 0, %v363_v48  ;;  %v366_v52 = vld [vmem:[#allocation2 + $0x80] sm:$0x1] }
  0x30   : > { %v369_v53 = vld [vmem:[#allocation2 + $0x8c] sm:$0x1]  ;;  %362 = vst [vmem:[#allocation2 + $0x68] sm:$0x1] %v361_v50  ;;  %365 = vst [vmem:[#allocation2 + $0x74] sm:$0x1] %v364_v51 }
  0x31   : > { %v367_v54 = vsel %vm3838_vm5, 0, %v366_v52  ;;  %v370_v55 = vsel %vm3838_vm5, 0, %v369_v53  ;;  %v372_v56 = vld [vmem:[#allocation2 + $0x98] sm:$0x1]  ;;  %v375_v57 = vld [vmem:[#allocation2 + $0xa4] sm:$0x1] }
  0x32   : > { %368 = vst [vmem:[#allocation2 + $0x80] sm:$0x1] %v367_v54  ;;  %371 = vst [vmem:[#allocation2 + $0x8c] sm:$0x1] %v370_v55  ;;  %v373_v58 = vsel %vm3838_vm5, 0, %v372_v56  ;;  %v376_v59 = vsel %vm3838_vm5, 0, %v375_v57 }
  0x33   : > { %v378_v60 = vld [vmem:[#allocation2 + $0xb0] sm:$0x1]  ;;  %v381_v61 = vld [vmem:[#allocation2 + $0xbc] sm:$0x1]  ;;  %374 = vst [vmem:[#allocation2 + $0x98] sm:$0x1] %v373_v58 }
  0x34   : > { %377 = vst [vmem:[#allocation2 + $0xa4] sm:$0x1] %v376_v59  ;;  %v379_v62 = vsel %vm3838_vm5, 0, %v378_v60  ;;  %v382_v63 = vsel %vm3838_vm5, 0, %v381_v61  ;;  %v384_v0 = vld [vmem:[#allocation2 + $0xc8] sm:$0x1] }
  0x35   : > { %v387_v2 = vld [vmem:[#allocation2 + $0xd4] sm:$0x1]  ;;  %380 = vst [vmem:[#allocation2 + $0xb0] sm:$0x1] %v379_v62  ;;  %383 = vst [vmem:[#allocation2 + $0xbc] sm:$0x1] %v382_v63 }
  0x36   : > { %v385_v3 = vsel %vm3838_vm5, 0, %v384_v0  ;;  %v388_v4 = vsel %vm3838_vm5, 0, %v387_v2  ;;  %v274_v5 = vld [vmem:[#allocation2] sm:$0x1]  ;;  %v277_v6 = vld [vmem:[#allocation2 + $0xc] sm:$0x1] }
  0x37   : > { %386 = vst [vmem:[#allocation2 + $0xc8] sm:$0x1] %v385_v3  ;;  %389 = vst [vmem:[#allocation2 + $0xd4] sm:$0x1] %v388_v4  ;;  %v275_v8 = vsel %vm3809_vm3, 0, %v274_v5  ;;  %v278_v9 = vsel %vm3809_vm3, 0, %v277_v6 }
  0x38   : > { %v328_v10 = vld [vmem:[#allocation2 + $0xd8] sm:$0x1]  ;;  %v331_v11 = vld [vmem:[#allocation2 + $0xe4] sm:$0x1]  ;;  %276 = vst [vmem:[#allocation2] sm:$0x1] %v275_v8 }
  0x39   : > { %279 = vst [vmem:[#allocation2 + $0xc] sm:$0x1] %v278_v9  ;;  %v329_v12 = vsel %vm3809_vm3, 0, %v328_v10  ;;  %v332_v13 = vsel %vm3809_vm3, 0, %v331_v11  ;;  %v336_v14 = vld [vmem:[#allocation2 + $0x8] sm:$0x1] }
  0x3a   : > { %v339_v15 = vld [vmem:[#allocation2 + $0x14] sm:$0x1]  ;;  %330 = vst [vmem:[#allocation2 + $0xd8] sm:$0x1] %v329_v12  ;;  %333 = vst [vmem:[#allocation2 + $0xe4] sm:$0x1] %v332_v13 }
  0x3b   : > { %v337_v16 = vsel %vm3838_vm5, 0, %v336_v14  ;;  %v340_v17 = vsel %vm3838_vm5, 0, %v339_v15  ;;  %v390_v18 = vld [vmem:[#allocation2 + $0xe0] sm:$0x1]  ;;  %v393_v19 = vld [vmem:[#allocation2 + $0xec] sm:$0x1] }
  0x3c   : > { %338 = vst [vmem:[#allocation2 + $0x8] sm:$0x1] %v337_v16  ;;  %341 = vst [vmem:[#allocation2 + $0x14] sm:$0x1] %v340_v17  ;;  %v391_v20 = vsel %vm3838_vm5, 0, %v390_v18  ;;  %v394_v21 = vsel %vm3838_vm5, 0, %v393_v19 }
  0x3d   : > { %v527_v22 = vshrl.u32 %v3446_v7, 16  ;;  %v530_v23 = vshll.u32 %v3446_v7, 16  ;;  %392 = vst [vmem:[#allocation2 + $0xe0] sm:$0x1] %v391_v20  ;;  %395 = vst [vmem:[#allocation2 + $0xec] sm:$0x1] %v394_v21 }
  0x3e   : > { %v397_v25 = vld [vmem:[%s3790_s6 + $0x8] sm:$0xff]  ;;  %v398_v26 = vld [vmem:[%s3790_s6 + $0x10] sm:$0xff]  ;;  %v399_v30 = vld [vmem:[%s3790_s6 + $0x18] sm:$0xff]  ;;  %vm524_vm7 = vsmask.f32 4368 }
  0x3f   : > { %v529_v27 = vrot.slane %v527_v22, 7  ;;  %v3447_v28 = vpack.c.bf16 %v397_v25, %v397_v25  ;;  %v3448_v29 = vpack.c.bf16 %v398_v26, %v398_v26  ;;  %v849_v24 = vld [vmem:[#allocation2 + $0x18] sm:$0xf]  ;;  %v3449_v32 = vpack.c.bf16 %v399_v30, %v399_v30  ;;  %v400_v33 = vld [vmem:[%s3790_s6 + $0x20] sm:$0xff]  ;;  %v401_v38 = vld [vmem:[%s3790_s6 + $0x28] sm:$0xff] }
  0x40   : > { %v402_v43 = vld [vmem:[%s3790_s6 + $0x30] sm:$0xff]  ;;  %v403_v44 = vld [vmem:[%s3790_s6 + $0x38] sm:$0xff]  ;;  %v3450_v47 = vpack.c.bf16 %v400_v33, %v400_v33  ;;  %v3451_v48 = vpack.c.bf16 %v401_v38, %v401_v38  ;;  %vm3920_vm8 = vmor %vm272_vm2, %vm524_vm7 }
  0x41   : > { %v532_v34 = vor.u32 %v530_v23, %v529_v27  ;;  %v533_v35 = vrot.slane %v529_v27, 4  ;;  %v535_v36 = vshrl.u32 %v3447_v28, 16  ;;  %v538_v37 = vshll.u32 %v3447_v28, 16  ;;  %v853_v50 = vld [vmem:[#allocation2 + $0x20] sm:$0x1]  ;;  %v405_v16 = vld [vmem:[%s3790_s6 + $0x48] sm:$0xff] }
  0x42   : > { %v544_v39 = vshrl.u32 %v3448_v29, 16  ;;  %v547_v40 = vshll.u32 %v3448_v29, 16  ;;  %v552_v41 = vshrl.u32 %v3449_v32, 16  ;;  %v555_v42 = vshll.u32 %v3449_v32, 16  ;;  %v856_v52 = vld [vmem:[#allocation2 + $0x24] sm:$0xf] }
  0x43   : > { %v850_v45 = vsel %vm3908_vm6, %v532_v34, %v849_v24  ;;  %v537_v46 = vrot.slane %v535_v36, 7  ;;  %v3452_v54 = vpack.c.bf16 %v402_v43, %v402_v43  ;;  %v3453_v55 = vpack.c.bf16 %v403_v44, %v403_v44  ;;  %v860_v58 = vld [vmem:[#allocation2 + $0x2c] sm:$0x1]  ;;  %v404_v6 = vld [vmem:[%s3790_s6 + $0x40] sm:$0xff]  ;;  %v863_v10 = vld [vmem:[#allocation2 + $0x30] sm:$0xf] }
  0x44   : > { %851 = vst [vmem:[#allocation2 + $0x18] sm:$0xf] %v850_v45  ;;  %v546_v51 = vrot.slane %v544_v39, 7  ;;  %v554_v53 = vrot.slane %v552_v41, 7  ;;  %v561_v59 = vshrl.u32 %v3450_v47, 16  ;;  %v564_v60 = vshll.u32 %v3450_v47, 16 }
  0x45   : > { %v540_v56 = vor.u32 %v538_v37, %v537_v46  ;;  %v542_v57 = vrot.slane %v537_v46, 4  ;;  %v569_v5 = vshrl.u32 %v3451_v48, 16  ;;  %v572_v11 = vshll.u32 %v3451_v48, 16  ;;  %v867_v17 = vld [vmem:[#allocation2 + $0x38] sm:$0x1]  ;;  %v406_v32 = vld [vmem:[%s3790_s6 + $0x50] sm:$0xff] }
  0x46   : > { %v549_v61 = vor.u32 %v547_v40, %v546_v51  ;;  %v550_v62 = vrot.slane %v546_v51, 4  ;;  %v557_v63 = vor.u32 %v555_v42, %v554_v53  ;;  %v559_v0 = vrot.slane %v554_v53, 4  ;;  %v870_v27 = vld [vmem:[#allocation2 + $0x3c] sm:$0xf]  ;;  %v874_v38 = vld [vmem:[#allocation2 + $0x44] sm:$0x1] }
  0x47   : > { %v541_v2 = vsel %vm3920_vm8, %v533_v35, %v540_v56  ;;  %v854_v3 = vsel %vm3809_vm3, %v542_v57, %v853_v50  ;;  %v563_v4 = vrot.slane %v561_v59, 7  ;;  %v571_v14 = vrot.slane %v569_v5, 7  ;;  %v407_v33 = vld [vmem:[%s3790_s6 + $0x58] sm:$0xff]  ;;  %v877_v44 = vld [vmem:[#allocation2 + $0x48] sm:$0xf]  ;;  %v408_v48 = vld [vmem:[%s3790_s6 + $0x60] sm:$0xff] }
  0x48   : > { %852 = vst.msk [vmem:[#allocation2 + $0x1c] sm:$0xf] %vm256_vm0, %v541_v2  ;;  %855 = vst [vmem:[#allocation2 + $0x20] sm:$0x1] %v854_v3  ;;  %v857_v7 = vsel %vm3908_vm6, %v549_v61, %v856_v52  ;;  %v558_v8 = vsel %vm3920_vm8, %v550_v62, %v557_v63  ;;  %v861_v9 = vsel %vm3809_vm3, %v559_v0, %v860_v58  ;;  %v578_v15 = vshrl.u32 %v3452_v54, 16  ;;  %v409_v50 = vld [vmem:[%s3790_s6 + $0x68] sm:$0xff] }
  0x49   : > { %858 = vst [vmem:[#allocation2 + $0x24] sm:$0xf] %v857_v7  ;;  %859 = vst.msk [vmem:[#allocation2 + $0x28] sm:$0xf] %vm256_vm0, %v558_v8  ;;  %v566_v12 = vor.u32 %v564_v60, %v563_v4  ;;  %v567_v13 = vrot.slane %v563_v4, 4  ;;  %v581_v18 = vshll.u32 %v3452_v54, 16  ;;  %v3454_v21 = vpack.c.bf16 %v404_v6, %v404_v6 }
  0x4a   : > { %862 = vst [vmem:[#allocation2 + $0x2c] sm:$0x1] %v861_v9  ;;  %v586_v19 = vshrl.u32 %v3453_v55, 16  ;;  %v589_v20 = vshll.u32 %v3453_v55, 16  ;;  %v574_v23 = vor.u32 %v572_v11, %v571_v14  ;;  %v576_v25 = vrot.slane %v571_v14, 4  ;;  %v410_v6 = vld [vmem:[%s3790_s6 + $0x70] sm:$0xff] }
  0x4b   : > { %v864_v22 = vsel %vm3908_vm6, %v566_v12, %v863_v10  ;;  %v580_v26 = vrot.slane %v578_v15, 7  ;;  %v595_v29 = vshrl.u32 %v3454_v21, 16  ;;  %v598_v30 = vshll.u32 %v3454_v21, 16  ;;  %v881_v60 = vld [vmem:[#allocation2 + $0x50] sm:$0x1]  ;;  %v411_v11 = vld [vmem:[%s3790_s6 + $0x78] sm:$0xff] }
  0x4c   : > { %865 = vst [vmem:[#allocation2 + $0x30] sm:$0xf] %v864_v22  ;;  %v588_v28 = vrot.slane %v586_v19, 7  ;;  %v3455_v24 = vpack.c.bf16 %v405_v16, %v405_v16  ;;  %v575_v34 = vsel %vm3920_vm8, %v567_v13, %v574_v23  ;;  %v868_v35 = vsel %vm3809_vm3, %v576_v25, %v867_v17  ;;  %v884_v4 = vld [vmem:[#allocation2 + $0x54] sm:$0xf]  ;;  %v412_v12 = vld [vmem:[%s3790_s6 + $0x80] sm:$0xff] }
  0x4d   : > { %v583_v36 = vor.u32 %v581_v18, %v580_v26  ;;  %v584_v37 = vrot.slane %v580_v26, 4  ;;  %866 = vst.msk [vmem:[#allocation2 + $0x34] sm:$0xf] %vm256_vm0, %v575_v34  ;;  %869 = vst [vmem:[#allocation2 + $0x38] sm:$0x1] %v868_v35  ;;  %v597_v41 = vrot.slane %v595_v29, 7  ;;  %v3456_v46 = vpack.c.bf16 %v406_v32, %v406_v32 }
  0x4e   : > { %v591_v39 = vor.u32 %v589_v20, %v588_v28  ;;  %v593_v40 = vrot.slane %v588_v28, 4  ;;  %v603_v42 = vshrl.u32 %v3455_v24, 16  ;;  %v606_v45 = vshll.u32 %v3455_v24, 16  ;;  %v888_v17 = vld [vmem:[#allocation2 + $0x5c] sm:$0x1] }
  0x4f   : > { %v871_v43 = vsel %vm3908_vm6, %v583_v36, %v870_v27  ;;  %v3457_v47 = vpack.c.bf16 %v407_v33, %v407_v33  ;;  %v600_v53 = vor.u32 %v598_v30, %v597_v41  ;;  %v601_v54 = vrot.slane %v597_v41, 4  ;;  %v891_v23 = vld [vmem:[#allocation2 + $0x60] sm:$0xf]  ;;  %v895_v32 = vld [vmem:[#allocation2 + $0x68] sm:$0x1] }
  0x50   : > { %872 = vst [vmem:[#allocation2 + $0x3c] sm:$0xf] %v871_v43  ;;  %v592_v51 = vsel %vm3920_vm8, %v584_v37, %v591_v39  ;;  %v875_v52 = vsel %vm3809_vm3, %v593_v40, %v874_v38  ;;  %v605_v55 = vrot.slane %v603_v42, 7  ;;  %v612_v56 = vshrl.u32 %v3456_v46, 16  ;;  %v413_v37 = vld [vmem:[%s3790_s6 + $0x88] sm:$0xff]  ;;  %v414_v38 = vld [vmem:[%s3790_s6 + $0x90] sm:$0xff] }
  0x51   : > { %873 = vst.msk [vmem:[#allocation2 + $0x40] sm:$0xf] %vm256_vm0, %v592_v51  ;;  %876 = vst [vmem:[#allocation2 + $0x44] sm:$0x1] %v875_v52  ;;  %v615_v57 = vshll.u32 %v3456_v46, 16  ;;  %v620_v58 = vshrl.u32 %v3457_v47, 16  ;;  %v878_v59 = vsel %vm3908_vm6, %v600_v53, %v877_v44  ;;  %v3458_v62 = vpack.c.bf16 %v408_v48, %v408_v48 }
  0x52   : > { %v623_v61 = vshll.u32 %v3457_v47, 16  ;;  %v3459_v63 = vpack.c.bf16 %v409_v50, %v409_v50  ;;  %879 = vst [vmem:[#allocation2 + $0x48] sm:$0xf] %v878_v59  ;;  %v608_v0 = vor.u32 %v606_v45, %v605_v55  ;;  %v610_v2 = vrot.slane %v605_v55, 4  ;;  %v415_v43 = vld [vmem:[%s3790_s6 + $0x98] sm:$0xff]  ;;  %v416_v44 = vld [vmem:[%s3790_s6 + $0xa0] sm:$0xff] }
  0x53   : > { %v614_v3 = vrot.slane %v612_v56, 7  ;;  %v622_v5 = vrot.slane %v620_v58, 7  ;;  %v629_v7 = vshrl.u32 %v3458_v62, 16  ;;  %v632_v8 = vshll.u32 %v3458_v62, 16  ;;  %v898_v50 = vld [vmem:[#allocation2 + $0x6c] sm:$0xf] }
  0x54   : > { %v637_v9 = vshrl.u32 %v3459_v63, 16  ;;  %v640_v10 = vshll.u32 %v3459_v63, 16  ;;  %v609_v13 = vsel %vm3920_vm8, %v601_v54, %v608_v0  ;;  %v882_v14 = vsel %vm3809_vm3, %v610_v2, %v881_v60  ;;  %v905_v58 = vld [vmem:[#allocation2 + $0x78] sm:$0xf] }
  0x55   : > { %v617_v15 = vor.u32 %v615_v57, %v614_v3  ;;  %v618_v16 = vrot.slane %v614_v3, 4  ;;  %880 = vst.msk [vmem:[#allocation2 + $0x4c] sm:$0xf] %vm256_vm0, %v609_v13  ;;  %883 = vst [vmem:[#allocation2 + $0x50] sm:$0x1] %v882_v14  ;;  %v625_v18 = vor.u32 %v623_v61, %v622_v5  ;;  %v627_v19 = vrot.slane %v622_v5, 4 }
  0x56   : > { %v631_v20 = vrot.slane %v629_v7, 7  ;;  %v639_v21 = vrot.slane %v637_v9, 7  ;;  %v3460_v25 = vpack.c.bf16 %v410_v6, %v410_v6  ;;  %v3461_v26 = vpack.c.bf16 %v411_v11, %v411_v11  ;;  %v902_v57 = vld [vmem:[#allocation2 + $0x74] sm:$0x1]  ;;  %v417_v6 = vld [vmem:[%s3790_s6 + $0xa8] sm:$0xff] }
  0x57   : > { %v885_v22 = vsel %vm3908_vm6, %v617_v15, %v884_v4  ;;  %v3462_v27 = vpack.c.bf16 %v412_v12, %v412_v12  ;;  %v626_v28 = vsel %vm3920_vm8, %v618_v16, %v625_v18  ;;  %v889_v29 = vsel %vm3809_vm3, %v627_v19, %v888_v17  ;;  %v418_v7 = vld [vmem:[%s3790_s6 + $0xb0] sm:$0xff]  ;;  %v909_v16 = vld [vmem:[#allocation2 + $0x80] sm:$0x1]  ;;  %v912_v17 = vld [vmem:[#allocation2 + $0x84] sm:$0xf] }
  0x58   : > { %886 = vst [vmem:[#allocation2 + $0x54] sm:$0xf] %v885_v22  ;;  %v634_v30 = vor.u32 %v632_v8, %v631_v20  ;;  %v635_v24 = vrot.slane %v631_v20, 4  ;;  %887 = vst.msk [vmem:[#allocation2 + $0x58] sm:$0xf] %vm256_vm0, %v626_v28  ;;  %v642_v33 = vor.u32 %v640_v10, %v639_v21  ;;  %v644_v34 = vrot.slane %v639_v21, 4 }
  0x59   : > { %890 = vst [vmem:[#allocation2 + $0x5c] sm:$0x1] %v889_v29  ;;  %v646_v35 = vshrl.u32 %v3460_v25, 16  ;;  %v649_v36 = vshll.u32 %v3460_v25, 16  ;;  %v654_v40 = vshrl.u32 %v3461_v26, 16  ;;  %v657_v41 = vshll.u32 %v3461_v26, 16 }
  0x5a   : > { %v892_v39 = vsel %vm3908_vm6, %v634_v30, %v891_v23  ;;  %v663_v42 = vshrl.u32 %v3462_v27, 16  ;;  %v643_v45 = vsel %vm3920_vm8, %v635_v24, %v642_v33  ;;  %v896_v46 = vsel %vm3809_vm3, %v644_v34, %v895_v32  ;;  %v419_v24 = vld [vmem:[%s3790_s6 + $0xb8] sm:$0xff] }
  0x5b   : > { %893 = vst [vmem:[#allocation2 + $0x60] sm:$0xf] %v892_v39  ;;  %v648_v47 = vrot.slane %v646_v35, 7  ;;  %v666_v48 = vshll.u32 %v3462_v27, 16  ;;  %894 = vst.msk [vmem:[#allocation2 + $0x64] sm:$0xf] %vm256_vm0, %v643_v45  ;;  %v3463_v53 = vpack.c.bf16 %v413_v37, %v413_v37  ;;  %v3464_v54 = vpack.c.bf16 %v414_v38, %v414_v38 }
  0x5c   : > { %897 = vst [vmem:[#allocation2 + $0x68] sm:$0x1] %v896_v46  ;;  %v656_v51 = vrot.slane %v654_v40, 7  ;;  %v665_v52 = vrot.slane %v663_v42, 7  ;;  %v3465_v59 = vpack.c.bf16 %v415_v43, %v415_v43  ;;  %v3466_v60 = vpack.c.bf16 %v416_v44, %v416_v44  ;;  %v916_v35 = vld [vmem:[#allocation2 + $0x8c] sm:$0x1] }
  0x5d   : > { %v651_v55 = vor.u32 %v649_v36, %v648_v47  ;;  %v652_v56 = vrot.slane %v648_v47, 4  ;;  %v671_v3 = vshrl.u32 %v3463_v53, 16  ;;  %v674_v4 = vshll.u32 %v3463_v53, 16  ;;  %v919_v36 = vld [vmem:[#allocation2 + $0x90] sm:$0xf]  ;;  %v420_v38 = vld [vmem:[%s3790_s6 + $0xc0] sm:$0xff] }
  0x5e   : > { %v659_v61 = vor.u32 %v657_v41, %v656_v51  ;;  %v661_v62 = vrot.slane %v656_v51, 4  ;;  %v668_v63 = vor.u32 %v666_v48, %v665_v52  ;;  %v669_v0 = vrot.slane %v665_v52, 4  ;;  %v923_v51 = vld [vmem:[#allocation2 + $0x98] sm:$0x1]  ;;  %v926_v52 = vld [vmem:[#allocation2 + $0x9c] sm:$0xf] }
  0x5f   : > { %v899_v2 = vsel %vm3908_vm6, %v651_v55, %v898_v50  ;;  %v680_v5 = vshrl.u32 %v3464_v54, 16  ;;  %v683_v11 = vshll.u32 %v3464_v54, 16  ;;  %v673_v12 = vrot.slane %v671_v3, 7  ;;  %v421_v54 = vld [vmem:[%s3790_s6 + $0xc8] sm:$0xff] }
  0x60   : > { %900 = vst [vmem:[#allocation2 + $0x6c] sm:$0xf] %v899_v2  ;;  %v660_v8 = vsel %vm3920_vm8, %v652_v56, %v659_v61  ;;  %v903_v9 = vsel %vm3809_vm3, %v661_v62, %v902_v57  ;;  %v906_v10 = vsel %vm3908_vm6, %v668_v63, %v905_v58  ;;  %v688_v14 = vshrl.u32 %v3465_v59, 16  ;;  %v424_v2 = vld [vmem:[%s3790_s6 + $0xe0] sm:$0xff]  ;;  %v425_v3 = vld [vmem:[%s3790_s6 + $0xe8] sm:$0xff] }
  0x61   : > { %901 = vst.msk [vmem:[#allocation2 + $0x70] sm:$0xf] %vm256_vm0, %v660_v8  ;;  %904 = vst [vmem:[#allocation2 + $0x74] sm:$0x1] %v903_v9  ;;  %v682_v13 = vrot.slane %v680_v5, 7  ;;  %v691_v15 = vshll.u32 %v3465_v59, 16  ;;  %v3467_v20 = vpack.c.bf16 %v417_v6, %v417_v6  ;;  %v3468_v21 = vpack.c.bf16 %v418_v7, %v418_v7 }
  0x62   : > { %907 = vst [vmem:[#allocation2 + $0x78] sm:$0xf] %v906_v10  ;;  %v697_v18 = vshrl.u32 %v3466_v60, 16  ;;  %v700_v19 = vshll.u32 %v3466_v60, 16  ;;  %v676_v22 = vor.u32 %v674_v4, %v673_v12  ;;  %v678_v23 = vrot.slane %v673_v12, 4  ;;  %v422_v59 = vld [vmem:[%s3790_s6 + $0xd0] sm:$0xff] }
  0x63   : > { %v685_v25 = vor.u32 %v683_v11, %v682_v13  ;;  %v686_v26 = vrot.slane %v682_v13, 4  ;;  %v690_v27 = vrot.slane %v688_v14, 7  ;;  %v705_v29 = vshrl.u32 %v3467_v20, 16  ;;  %v423_v60 = vld [vmem:[%s3790_s6 + $0xd8] sm:$0xff]  ;;  %v930_v12 = vld [vmem:[#allocation2 + $0xa4] sm:$0x1] }
  0x64   : > { %v699_v28 = vrot.slane %v697_v18, 7  ;;  %v708_v30 = vshll.u32 %v3467_v20, 16  ;;  %v677_v32 = vsel %vm3920_vm8, %v669_v0, %v676_v22  ;;  %v910_v33 = vsel %vm3809_vm3, %v678_v23, %v909_v16  ;;  %v933_v13 = vld [vmem:[#allocation2 + $0xa8] sm:$0xf] }
  0x65   : > { %v913_v34 = vsel %vm3908_vm6, %v685_v25, %v912_v17  ;;  %v714_v37 = vshrl.u32 %v3468_v21, 16  ;;  %908 = vst.msk [vmem:[#allocation2 + $0x7c] sm:$0xf] %vm256_vm0, %v677_v32  ;;  %911 = vst [vmem:[#allocation2 + $0x80] sm:$0x1] %v910_v33  ;;  %v693_v39 = vor.u32 %v691_v15, %v690_v27  ;;  %v695_v40 = vrot.slane %v690_v27, 4 }
  0x66   : > { %914 = vst [vmem:[#allocation2 + $0x84] sm:$0xf] %v913_v34  ;;  %v702_v41 = vor.u32 %v700_v19, %v699_v28  ;;  %v703_v42 = vrot.slane %v699_v28, 4  ;;  %v707_v43 = vrot.slane %v705_v29, 7  ;;  %v717_v45 = vshll.u32 %v3468_v21, 16 }
  0x67   : > { %v716_v44 = vrot.slane %v714_v37, 7  ;;  %v3469_v46 = vpack.c.bf16 %v419_v24, %v419_v24  ;;  %v694_v47 = vsel %vm3920_vm8, %v686_v26, %v693_v39  ;;  %v917_v48 = vsel %vm3809_vm3, %v695_v40, %v916_v35  ;;  %v940_v35 = vld [vmem:[#allocation2 + $0xb4] sm:$0xf] }
  0x68   : > { %v920_v50 = vsel %vm3908_vm6, %v702_v41, %v919_v36  ;;  %v3470_v53 = vpack.c.bf16 %v420_v38, %v420_v38  ;;  %915 = vst.msk [vmem:[#allocation2 + $0x88] sm:$0xf] %vm256_vm0, %v694_v47  ;;  %918 = vst [vmem:[#allocation2 + $0x8c] sm:$0x1] %v917_v48  ;;  %v710_v55 = vor.u32 %v708_v30, %v707_v43  ;;  %v712_v56 = vrot.slane %v707_v43, 4  ;;  %v426_v41 = vld [vmem:[%s3790_s6 + $0xf0] sm:$0xff] }
  0x69   : > { %921 = vst [vmem:[#allocation2 + $0x90] sm:$0xf] %v920_v50  ;;  %v719_v57 = vor.u32 %v717_v45, %v716_v44  ;;  %v720_v58 = vrot.slane %v716_v44, 4  ;;  %v722_v61 = vshrl.u32 %v3469_v46, 16  ;;  %v725_v62 = vshll.u32 %v3469_v46, 16 }
  0x6a   : > { %v731_v63 = vshrl.u32 %v3470_v53, 16  ;;  %v734_v0 = vshll.u32 %v3470_v53, 16  ;;  %v711_v4 = vsel %vm3920_vm8, %v703_v42, %v710_v55  ;;  %v924_v5 = vsel %vm3809_vm3, %v712_v56, %v923_v51  ;;  %v937_v30 = vld [vmem:[#allocation2 + $0xb0] sm:$0x1]  ;;  %v427_v42 = vld [vmem:[%s3790_s6 + $0xf8] sm:$0xff] }
  0x6b   : > { %v927_v6 = vsel %vm3908_vm6, %v719_v57, %v926_v52  ;;  %v3471_v7 = vpack.c.bf16 %v421_v54, %v421_v54  ;;  %922 = vst.msk [vmem:[#allocation2 + $0x94] sm:$0xf] %vm256_vm0, %v711_v4  ;;  %925 = vst [vmem:[#allocation2 + $0x98] sm:$0x1] %v924_v5  ;;  %v724_v8 = vrot.slane %v722_v61, 7  ;;  %v3472_v10 = vpack.c.bf16 %v422_v59, %v422_v59 }
  0x6c   : > { %928 = vst [vmem:[#allocation2 + $0x9c] sm:$0xf] %v927_v6  ;;  %v733_v9 = vrot.slane %v731_v63, 7  ;;  %v3473_v11 = vpack.c.bf16 %v423_v60, %v423_v60  ;;  %v3474_v16 = vpack.c.bf16 %v424_v2, %v424_v2  ;;  %v3475_v17 = vpack.c.bf16 %v425_v3, %v425_v3  ;;  %v944_v47 = vld [vmem:[#allocation2 + $0xbc] sm:$0x1] }
  0x6d   : > { %v739_v14 = vshrl.u32 %v3471_v7, 16  ;;  %v742_v15 = vshll.u32 %v3471_v7, 16  ;;  %v727_v18 = vor.u32 %v725_v62, %v724_v8  ;;  %v729_v19 = vrot.slane %v724_v8, 4  ;;  %v947_v54 = vld [vmem:[#allocation2 + $0xc0] sm:$0xf] }
  0x6e   : > { %v736_v20 = vor.u32 %v734_v0, %v733_v9  ;;  %v737_v21 = vrot.slane %v733_v9, 4  ;;  %v748_v23 = vshrl.u32 %v3472_v10, 16  ;;  %v751_v25 = vshll.u32 %v3472_v10, 16  ;;  %v951_v61 = vld [vmem:[#allocation2 + $0xc8] sm:$0x1] }
  0x6f   : > { %v741_v22 = vrot.slane %v739_v14, 7  ;;  %v756_v26 = vshrl.u32 %v3473_v11, 16  ;;  %v728_v27 = vsel %vm3920_vm8, %v720_v58, %v727_v18  ;;  %v931_v28 = vsel %vm3809_vm3, %v729_v19, %v930_v12  ;;  %v954_v9 = vld [vmem:[#allocation2 + $0xcc] sm:$0xf] }
  0x70   : > { %v934_v29 = vsel %vm3908_vm6, %v736_v20, %v933_v13  ;;  %v759_v24 = vshll.u32 %v3473_v11, 16  ;;  %929 = vst.msk [vmem:[#allocation2 + $0xa0] sm:$0xf] %vm256_vm0, %v728_v27  ;;  %932 = vst [vmem:[#allocation2 + $0xa4] sm:$0x1] %v931_v28  ;;  %v750_v34 = vrot.slane %v748_v23, 7  ;;  %v3476_v55 = vpack.c.bf16 %v426_v41, %v426_v41 }
  0x71   : > { %935 = vst [vmem:[#allocation2 + $0xa8] sm:$0xf] %v934_v29  ;;  %v744_v32 = vor.u32 %v742_v15, %v741_v22  ;;  %v746_v33 = vrot.slane %v741_v22, 4  ;;  %v758_v36 = vrot.slane %v756_v26, 7  ;;  %v765_v37 = vshrl.u32 %v3474_v16, 16 }
  0x72   : > { %v768_v38 = vshll.u32 %v3474_v16, 16  ;;  %v773_v39 = vshrl.u32 %v3475_v17, 16  ;;  %v776_v40 = vshll.u32 %v3475_v17, 16  ;;  %v753_v45 = vor.u32 %v751_v25, %v750_v34  ;;  %v958_v13 = vld [vmem:[#allocation2 + $0xd4] sm:$0x1] }
  0x73   : > { %v745_v43 = vsel %vm3920_vm8, %v737_v21, %v744_v32  ;;  %v938_v44 = vsel %vm3809_vm3, %v746_v33, %v937_v30  ;;  %v754_v46 = vrot.slane %v750_v34, 4  ;;  %v761_v48 = vor.u32 %v759_v24, %v758_v36 }
  0x74   : > { %936 = vst.msk [vmem:[#allocation2 + $0xac] sm:$0xf] %vm256_vm0, %v745_v43  ;;  %939 = vst [vmem:[#allocation2 + $0xb0] sm:$0x1] %v938_v44  ;;  %v763_v50 = vrot.slane %v758_v36, 4  ;;  %v767_v51 = vrot.slane %v765_v37, 7  ;;  %v941_v53 = vsel %vm3908_vm6, %v753_v45, %v940_v35  ;;  %v3477_v56 = vpack.c.bf16 %v427_v42, %v427_v42 }
  0x75   : > { %v775_v52 = vrot.slane %v773_v39, 7  ;;  %942 = vst [vmem:[#allocation2 + $0xb4] sm:$0xf] %v941_v53  ;;  %v762_v57 = vsel %vm3920_vm8, %v754_v46, %v761_v48  ;;  %v782_v0 = vshrl.u32 %v3476_v55, 16  ;;  %v785_v2 = vshll.u32 %v3476_v55, 16 }
  0x76   : > { %v945_v58 = vsel %vm3809_vm3, %v763_v50, %v944_v47  ;;  %v770_v59 = vor.u32 %v768_v38, %v767_v51  ;;  %v771_v60 = vrot.slane %v767_v51, 4  ;;  %943 = vst.msk [vmem:[#allocation2 + $0xb8] sm:$0xf] %vm256_vm0, %v762_v57  ;;  %v790_v4 = vshrl.u32 %v3477_v56, 16 }
  0x77   : > { %946 = vst [vmem:[#allocation2 + $0xbc] sm:$0x1] %v945_v58  ;;  %v778_v62 = vor.u32 %v776_v40, %v775_v52  ;;  %v780_v63 = vrot.slane %v775_v52, 4  ;;  %v793_v5 = vshll.u32 %v3477_v56, 16  ;;  %v784_v8 = vrot.slane %v782_v0, 7 }
  0x78   : > { %v948_v3 = vsel %vm3908_vm6, %v770_v59, %v947_v54  ;;  %v792_v10 = vrot.slane %v790_v4, 7 }
  0x79   : > { %949 = vst [vmem:[#allocation2 + $0xc0] sm:$0xf] %v948_v3  ;;  %v779_v6 = vsel %vm3920_vm8, %v771_v60, %v778_v62  ;;  %v952_v7 = vsel %vm3809_vm3, %v780_v63, %v951_v61  ;;  %v787_v11 = vor.u32 %v785_v2, %v784_v8  ;;  %v788_v12 = vrot.slane %v784_v8, 4 }
  0x7a   : > { %950 = vst.msk [vmem:[#allocation2 + $0xc4] sm:$0xf] %vm256_vm0, %v779_v6  ;;  %953 = vst [vmem:[#allocation2 + $0xc8] sm:$0x1] %v952_v7  ;;  %v795_v14 = vor.u32 %v793_v5, %v792_v10  ;;  %v797_v15 = vrot.slane %v792_v10, 4 }
  0x7b   : > { %v955_v16 = vsel %vm3908_vm6, %v787_v11, %v954_v9 }
  0x7c   : > { %956 = vst [vmem:[#allocation2 + $0xcc] sm:$0xf] %v955_v16  ;;  %v796_v17 = vsel %vm3920_vm8, %v788_v12, %v795_v14  ;;  %v959_v18 = vsel %vm3809_vm3, %v797_v15, %v958_v13 }
  0x7d   : > { %957 = vst.msk [vmem:[#allocation2 + $0xd0] sm:$0xf] %vm256_vm0, %v796_v17  ;;  %960 = vst [vmem:[#allocation2 + $0xd4] sm:$0x1] %v959_v18 }
  0x7e PF: > { %s3478_s13 = smul.u32 96, %s3693_s18  ;;  %vm1283_vm9 = vcmask 1046528   ;;  %vm1142_vm10 = vsmask.f32 7424  ;;  %s3712_s15 = smov 12   ;;  %vm2123_vm11 = vcmask 1041408  }
  0x7f   : > { %s3713_s16 = smov 8   ;;  %s3714_s17 = smov 4   ;;  %vm1914_vm12 = vcmask 31744   ;;  %vm1935_vm13 = vcmask 64512   ;;  %vm1956_vm14 = vcmask 97280   ;;  %vm1977_vm15 = vcmask 130048  }
  0x80   : > { %s4059_s14 = scalar_lea.vmem [#allocation2], %s3478_s13  ;;  %s3715_s19 = smov 16   ;;  %vm4972_vm0 = vcmask 162816   ;;  %vm4971_vm1 = vcmask 195584   ;;  %vm4970_vm2 = vcmask 228352   ;;  %vm4969_vm3 = vcmask 261120  }
  0x81   : > { %s3716_s26 = smov 20   ;;  %s3717_s27 = smov 24   ;;  %vm4968_vm4 = vcmask 293888  }
  0x82   : > { %s3718_s28 = smov 28   ;;  %s3719_s29 = smov 32  }
  0x83   : > { %s3429_s13 = sadd.s32 4294967295, %s3783_s25 }
  0x84   : > { %v4062_v31 = vld [vmem:[%s4059_s14 + $0x18] sm:$0xff]   ;;  %v4065_v1 = vld [vmem:[%s4059_s14 + $0xc] sm:$0xff]   ;;  %v4072_v49 = vld [vmem:[%s4059_s14] sm:$0xff]  }
  0x85   : > { %1386 = vrot.lane.b32.xlu1 %v4062_v31, %s3712_s15  ;;  %1384 = vrot.lane.b32.xlu0 %v4065_v1, %s3712_s15  ;;  %v3606_v19 = vld [vmem:[%s4059_s14 + $0x8] ss:$0 sps:$4 sm:$0x11]   ;;  %v4076_v20 = vld [vmem:[%s4059_s14 + $0xc] sm:$0xff]   ;;  %v1447_v21 = vshrl.u32 %v4062_v31, 16  ;;  %v1284_v22 = vrot.slane %v4072_v49, 1 }
  0x86   : > { %v1285_v23 = vrot.slane %v3606_v19, 1  ;;  %v1144_v25 = vshrl.u32 %v4072_v49, 16  ;;  %v1146_v26 = vshll.u32 %v4072_v49, 16  ;;  %v1151_v27 = vshll.u32 %v3606_v19, 16  ;;  %v4096_v53 = vld [vmem:[%s4059_s14 + $0x24] sm:$0xff]   ;;  %v4102_v57 = vld [vmem:[%s4059_s14 + $0x18] sm:$0xff]  }
  0x87   : > { %v3608_v28 = vld [vmem:[%s4059_s14 + $0x14] ss:$0 sps:$4 sm:$0x11]   ;;  %v1287_v29 = vrot.slane %v4076_v20, 1  ;;  %v1156_v30 = vshrl.u32 %v4076_v20, 16  ;;  %v1158_v33 = vshll.u32 %v4076_v20, 16 }
  0x88   : > { %v1286_v24 = vsel %vm1283_vm9, %v1284_v22, %v1285_v23  ;;  %v1148_v32 = vrot.slane %v1146_v26, 1  ;;  %v3609_v34 = vld [vmem:[%s4059_s14 + $0x20] ss:$0 sps:$4 sm:$0x11]   ;;  %v1449_v35 = vshll.u32 %v4062_v31, 16  ;;  %v1153_v36 = vrot.slane %v1151_v27, 1 }
  0x89   : > { %1314 = vrot.lane.b32.xlu1 %v1286_v24, %s3713_s16  ;;  %v1288_v37 = vrot.slane %v3608_v28, 1  ;;  %v1163_v38 = vshll.u32 %v3608_v28, 16  ;;  %v1160_v40 = vrot.slane %v1158_v33, 1  ;;  %v1454_v42 = vshll.u32 %v3609_v34, 16  ;;  %v4111_v2 = vld [vmem:[%s4059_s14 + $0x18] sm:$0xff]   ;;  %v3617_v18 = vld [vmem:[%s4059_s14 + $0x24] sm:$0xff]  }
  0x8a   : > { %v1149_v39 = vor.u32 %v1148_v32, %v1144_v25  ;;  %v1451_v41 = vrot.slane %v1449_v35, 1  ;;  %v3610_v43 = vld [vmem:[%s4059_s14 + $0x14] ss:$0 sps:$4 sm:$0x11]   ;;  %v1435_v46 = vshrl.u32 %v4065_v1, 16  ;;  %v1437_v47 = vshll.u32 %v4065_v1, 16 }
  0x8b   : > { %v1289_v44 = vsel %vm1283_vm9, %v1287_v29, %v1288_v37  ;;  %v1165_v45 = vrot.slane %v1163_v38, 1  ;;  %v1161_v50 = vor.u32 %v1160_v40, %v1156_v30  ;;  %v1456_v52 = vrot.slane %v1454_v42, 1  ;;  %v4107_v61 = vld [vmem:[%s4059_s14 + $0x2c] ss:$0 sps:$4 sm:$0x11]   ;;  %v3619_v40 = vld [vmem:[%s4059_s14 + $0x30] sm:$0xff]  }
  0x8c   : > { %v1154_v48 = vsel %vm1142_vm10, %v1149_v39, %v1153_v36  ;;  %v1452_v51 = vor.u32 %v1451_v41, %v1447_v21  ;;  %v1439_v54 = vrot.slane %v1437_v47, 1  ;;  %v1442_v55 = vshll.u32 %v3610_v43, 16  ;;  %v3614_v6 = vld [vmem:[%s4059_s14 + $0x20] ss:$0 sps:$4 sm:$0x11]  }
  0x8d   : > { %1263 = vrot.lane.b32.xlu0 %v1154_v48, %s3714_s17  ;;  %1316 = vrot.lane.b32.xlu1 %v1289_v44, %s3713_s16  ;;  %v1577_v56 = vrot.slane %v4062_v31, 1  ;;  %v1166_v58 = vsel %vm1142_vm10, %v1161_v50, %v1165_v45  ;;  %v1578_v60 = vrot.slane %v3609_v34, 1  ;;  %v1574_v0 = vrot.slane %v4065_v1, 1  ;;  %v4125_v14 = vld [vmem:[%s4059_s14 + $0x20] ss:$0 sps:$4 sm:$0x11]  }
  0x8e   : > { %v1457_v59 = vsel %vm1142_vm10, %v1452_v51, %v1456_v52  ;;  %v1440_v62 = vor.u32 %v1439_v54, %v1435_v46  ;;  %v1444_v63 = vrot.slane %v1442_v55, 1  ;;  %v1575_v3 = vrot.slane %v3610_v43, 1  ;;  %v3618_v23 = vld [vmem:[%s4059_s14 + $0x2c] ss:$0 sps:$4 sm:$0x11]   ;;  %v3620_v48 = vld [vmem:[%s4059_s14 + $0x24] sm:$0xff]  }
  0x8f   : > { %v1739_v4 = vshll.u32 %v4096_v53, 16  ;;  %v1744_v5 = vshll.u32 %v4107_v61, 16  ;;  %v1737_v7 = vshrl.u32 %v4096_v53, 16  ;;  %v1727_v8 = vshll.u32 %v4102_v57, 16 }
  0x90   : > { %v1445_v9 = vsel %vm1142_vm10, %v1440_v62, %v1444_v63  ;;  %v1579_v10 = vsel %vm1283_vm9, %v1577_v56, %v1578_v60  ;;  %v1170_v12 = vshll.u32 %v4111_v2, 16  ;;  %v1725_v13 = vshrl.u32 %v4102_v57, 16  ;;  %v3621_v44 = vld [vmem:[%s4059_s14 + $0x38] ss:$0 sps:$4 sm:$0x11]   ;;  %v4161_v60 = vld [vmem:[%s4059_s14 + $0x3c] sm:$0xff]  }
  0x91   : > { %1265 = vrot.lane.b32.xlu0 %v1166_v58, %s3714_s17  ;;  %1556 = vrot.lane.b32.xlu1 %v1457_v59, %s3715_s19  ;;  %v1741_v11 = vrot.slane %v1739_v4, 1  ;;  %v1746_v15 = vrot.slane %v1744_v5, 1  ;;  %v1732_v16 = vshll.u32 %v3614_v6, 16  ;;  %v1168_v17 = vshrl.u32 %v4111_v2, 16  ;;  %v4168_v5 = vld [vmem:[%s4059_s14 + $0x30] sm:$0xff]  }
  0x92   : > { %v1729_v1 = vrot.slane %v1727_v8, 1  ;;  %v1172_v19 = vrot.slane %v1170_v12, 1  ;;  %v1576_v21 = vsel %vm1283_vm9, %v1574_v0, %v1575_v3  ;;  %v1175_v22 = vshll.u32 %v4125_v14, 16  ;;  %v3622_v55 = vld [vmem:[%s4059_s14 + $0x2c] ss:$0 sps:$4 sm:$0x11]  }
  0x93   : > { %v1742_v31 = vor.u32 %v1741_v11, %v1737_v7  ;;  %v1182_v25 = vshll.u32 %v3617_v18, 16  ;;  %v1734_v28 = vrot.slane %v1732_v16, 1  ;;  %v1180_v24 = vshrl.u32 %v3617_v18, 16  ;;  %v4173_v8 = vld [vmem:[%s4059_s14 + $0x44] ss:$0 sps:$4 sm:$0x11]  }
  0x94   : > { %v1730_v27 = vor.u32 %v1729_v1, %v1725_v13  ;;  %v1173_v29 = vor.u32 %v1172_v19, %v1168_v17  ;;  %v1177_v30 = vrot.slane %v1175_v22, 1  ;;  %v1187_v33 = vshll.u32 %v3618_v23, 16 }
  0x95   : > { %1554 = vrot.lane.b32.xlu0 %v1445_v9, %s3715_s19  ;;  %1606 = vrot.lane.b32.xlu1 %v1579_v10, %s3716_s26  ;;  %v1747_v26 = vsel %vm1142_vm10, %v1742_v31, %v1746_v15  ;;  %v1184_v32 = vrot.slane %v1182_v25, 1  ;;  %v1864_v34 = vrot.slane %v4102_v57, 1  ;;  %v1865_v35 = vrot.slane %v3614_v6, 1  ;;  %v4176_v9 = vld [vmem:[%s4059_s14 + $0x30] sm:$0xff]  }
  0x96   : > { %v1735_v36 = vsel %vm1142_vm10, %v1730_v27, %v1734_v28  ;;  %v1178_v37 = vsel %vm1142_vm10, %v1173_v29, %v1177_v30  ;;  %v1189_v39 = vrot.slane %v1187_v33, 1  ;;  %v1867_v41 = vrot.slane %v4096_v53, 1  ;;  %v3626_v15 = vld [vmem:[%s4059_s14 + $0x38] ss:$0 sps:$4 sm:$0x11]  }
  0x97   : > { %v1185_v38 = vor.u32 %v1184_v32, %v1180_v24  ;;  %v1866_v42 = vsel %vm1283_vm9, %v1864_v34, %v1865_v35  ;;  %v1868_v43 = vrot.slane %v4107_v61, 1  ;;  %v1293_v46 = vrot.slane %v3617_v18, 1  ;;  %v4186_v18 = vld [vmem:[%s4059_s14 + $0x38] ss:$0 sps:$4 sm:$0x11]  }
  0x98   : > { %v1294_v47 = vrot.slane %v3618_v23, 1  ;;  %v1473_v50 = vshll.u32 %v3619_v40, 16  ;;  %v1290_v51 = vrot.slane %v4111_v2, 1  ;;  %v1291_v52 = vrot.slane %v4125_v14, 1  ;;  %v4192_v23 = vld [vmem:[%s4059_s14 + $0x3c] sm:$0xff]  }
  0x99   : > { %1604 = vrot.lane.b32.xlu0 %v1576_v21, %s3716_s26  ;;  %1676 = vrot.lane.b32.xlu1 %v4096_v53, %s3717_s27  ;;  %v1190_v45 = vsel %vm1142_vm10, %v1185_v38, %v1189_v39  ;;  %v1471_v53 = vshrl.u32 %v3619_v40, 16  ;;  %v1478_v54 = vshll.u32 %v3621_v44, 16  ;;  %v1869_v56 = vsel %vm1283_vm9, %v1867_v41, %v1868_v43  ;;  %v3630_v34 = vld [vmem:[%s4059_s14 + $0x44] ss:$0 sps:$4 sm:$0x11]  }
  0x9a   : > { %v1475_v58 = vrot.slane %v1473_v50, 1  ;;  %v1461_v59 = vshll.u32 %v3620_v48, 16  ;;  %v1292_v61 = vsel %vm1283_vm9, %v1290_v51, %v1291_v52  ;;  %v1459_v62 = vshrl.u32 %v3620_v48, 16  ;;  %v3631_v51 = vld [vmem:[%s4059_s14 + $0x48] sm:$0xff]  }
  0x9b   : > { %v1480_v0 = vrot.slane %v1478_v54, 1  ;;  %v1466_v3 = vshll.u32 %v3622_v55, 16  ;;  %v1763_v4 = vshll.u32 %v4161_v60, 16  ;;  %v1583_v6 = vrot.slane %v3619_v40, 1  ;;  %v4217_v54 = vld [vmem:[%s4059_s14 + $0x3c] sm:$0xff]  }
  0x9c   : > { %v1476_v63 = vor.u32 %v1475_v58, %v1471_v53  ;;  %v1463_v2 = vrot.slane %v1461_v59, 1  ;;  %v1584_v7 = vrot.slane %v3621_v44, 1  ;;  %v1761_v13 = vshrl.u32 %v4161_v60, 16  ;;  %v3633_v59 = vld [vmem:[%s4059_s14 + $0x50] ss:$0 sps:$4 sm:$0x11]  }
  0x9d   : > { %1674 = vrot.lane.b32.xlu0 %v4102_v57, %s3717_s27  ;;  %1846 = vrot.lane.b32.xlu1 %v1747_v26, %s3718_s28  ;;  %v1295_v57 = vsel %vm1283_vm9, %v1293_v46, %v1294_v47  ;;  %v1468_v12 = vrot.slane %v1466_v3, 1  ;;  %v1765_v14 = vrot.slane %v1763_v4, 1  ;;  %v1768_v16 = vshll.u32 %v4173_v8, 16 }
  0x9e   : > { %v1481_v10 = vsel %vm1142_vm10, %v1476_v63, %v1480_v0  ;;  %v1464_v11 = vor.u32 %v1463_v2, %v1459_v62  ;;  %v1751_v17 = vshll.u32 %v4168_v5, 16  ;;  %v1194_v31 = vshll.u32 %v4176_v9, 16  ;;  %v3634_v2 = vld [vmem:[%s4059_s14 + $0x44] ss:$0 sps:$4 sm:$0x11]  }
  0x9f   : > { %v1585_v19 = vsel %vm1283_vm9, %v1583_v6, %v1584_v7  ;;  %v1580_v21 = vrot.slane %v3620_v48, 1  ;;  %v1581_v22 = vrot.slane %v3622_v55, 1  ;;  %v1749_v25 = vshrl.u32 %v4168_v5, 16  ;;  %v4234_v7 = vld [vmem:[%s4059_s14 + $0x54] sm:$0xff]  }
  0xa0   : > { %v1469_v1 = vsel %vm1142_vm10, %v1464_v11, %v1468_v12  ;;  %v1766_v26 = vor.u32 %v1765_v14, %v1761_v13  ;;  %v1756_v27 = vshll.u32 %v3626_v15, 16  ;;  %v1192_v28 = vshrl.u32 %v4176_v9, 16 }
  0xa1   : > { %1844 = vrot.lane.b32.xlu0 %v1735_v36, %s3718_s28  ;;  %1267 = vrot.lane.b32.xlu1 %v1178_v37, %s3714_s17  ;;  %v1770_v29 = vrot.slane %v1768_v16, 1  ;;  %v1753_v30 = vrot.slane %v1751_v17, 1  ;;  %v1196_v24 = vrot.slane %v1194_v31, 1  ;;  %v1199_v32 = vshll.u32 %v4186_v18, 16  ;;  %v4241_v16 = vld [vmem:[%s4059_s14 + $0x48] sm:$0xff]  }
  0xa2   : > { %v1582_v33 = vsel %vm1283_vm9, %v1580_v21, %v1581_v22  ;;  %v1206_v35 = vshll.u32 %v4192_v23, 16  ;;  %v1758_v38 = vrot.slane %v1756_v27, 1  ;;  %v1204_v39 = vshrl.u32 %v4192_v23, 16  ;;  %v4244_v17 = vld [vmem:[%s4059_s14 + $0x5c] ss:$0 sps:$4 sm:$0x11]  }
  0xa3   : > { %v1771_v36 = vsel %vm1142_vm10, %v1766_v26, %v1770_v29  ;;  %v1754_v37 = vor.u32 %v1753_v30, %v1749_v25  ;;  %v1201_v41 = vrot.slane %v1199_v32, 1  ;;  %v1211_v43 = vshll.u32 %v3630_v34, 16  ;;  %v3656_v21 = vld [vmem:[%s4963_s1 + $0x10] ss:$0 sps:$4 sm:$0x33]   ;;  %v3659_v26 = vld [vmem:[%s4963_s1 + $0x8] sm:$0xff]  }
  0xa4   : > { %v1870_v44 = vrot.slane %v4168_v5, 1  ;;  %v1873_v52 = vrot.slane %v4161_v60, 1  ;;  %v1874_v53 = vrot.slane %v4173_v8, 1  ;;  %v1299_v55 = vrot.slane %v4192_v23, 1  ;;  %3552 = vmatprep.subr.msk.bf16.mxu0 %vm2123_vm11, %v3656_v21 }
  0xa5   : > { %1894 = vrot.lane.b32.xlu0 %v1866_v42, %s3719_s29  ;;  %1269 = vrot.lane.b32.xlu1 %v1190_v45, %s3714_s17  ;;  %v1208_v42 = vrot.slane %v1206_v35, 1  ;;  %v1871_v45 = vrot.slane %v3626_v15, 1  ;;  %v1759_v46 = vsel %vm1142_vm10, %v1754_v37, %v1758_v38  ;;  %v1213_v50 = vrot.slane %v1211_v43, 1  ;;  %v3638_v27 = vld [vmem:[%s4059_s14 + $0x50] ss:$0 sps:$4 sm:$0x11]  }
  0xa6   : > { %v1875_v62 = vsel %vm1283_vm9, %v1873_v52, %v1874_v53  ;;  %v1297_v0 = vrot.slane %v4186_v18, 1  ;;  %v1495_v3 = vshrl.u32 %v3631_v51, 16  ;;  %v1485_v6 = vshll.u32 %v4217_v54, 16 }
  0xa7   : > { %v1483_v13 = vshrl.u32 %v4217_v54, 16  ;;  %v1589_v15 = vrot.slane %v3631_v51, 1  ;;  %v1787_v18 = vshll.u32 %v4234_v7, 16  ;;  %v1785_v29 = vshrl.u32 %v4234_v7, 16 }
  0xa8   : > { %v1487_v14 = vrot.slane %v1485_v6, 1  ;;  %v1775_v32 = vshll.u32 %v4241_v16, 16  ;;  %v1586_v37 = vrot.slane %v4217_v54, 1  ;;  %v1587_v38 = vrot.slane %v3634_v2, 1 }
  0xa9   : > { %1896 = vrot.lane.b32.xlu0 %v1869_v56, %s3719_s29  ;;  %1320 = vrot.lane.b32.xlu1 %v1295_v57, %s3713_s16  ;;  %v1300_v56 = vrot.slane %v3630_v34, 1  ;;  %v1872_v57 = vsel %vm1283_vm9, %v1870_v44, %v1871_v45  ;;  %v1789_v30 = vrot.slane %v1787_v18, 1  ;;  %v1780_v44 = vshll.u32 %v3638_v27, 16 }
  0xaa   : > { %v1488_v25 = vor.u32 %v1487_v14, %v1483_v13  ;;  %v1777_v43 = vrot.slane %v1775_v32, 1  ;;  %v1880_v6 = vrot.slane %v4244_v17, 1  ;;  %v3644_v13 = vld [vmem:[%s4059_s14 + $0x54] sm:$0xff]   ;;  %v3645_v14 = vld [vmem:[%s4059_s14 + $0x68] ss:$0 sps:$4 sm:$0x11]  }
  0xab   : > { %v1301_v63 = vsel %vm1283_vm9, %v1299_v55, %v1300_v56 }
  0xad   : > { %1318 = vrot.lane.b32.xlu0 %v1292_v61, %s3713_s16  ;;  %1390 = vrot.lane.b32.xlu1 %v3619_v40, %s3712_s15  ;;  %v1197_v40 = vor.u32 %v1196_v24, %v1192_v28  ;;  %v1497_v61 = vshll.u32 %v3631_v51, 16  ;;  %v2125_v28 = vsel %vm2123_vm11, %v3656_v21, 0  ;;  %v1792_v24 = vshll.u32 %v4244_v17, 16 }
  0xae   : > { %3505 = vmatpush3.bf16.msra.mxu0 %v2125_v28  ;;  %v1526_v21 = vshll.u32 %v3645_v14, 16  ;;  %v1507_v28 = vshrl.u32 %v3644_v13, 16 }
  0xaf   : > { %v1202_v47 = vsel %vm1142_vm10, %v1197_v40, %v1201_v41  ;;  %v1499_v4 = vrot.slane %v1497_v61, 1  ;;  %3506 = vmatprep.subr.bf16.mxu0 %v3659_v26  ;;  %v3661_v40 = vld [vmem:[%s4963_s1] sm:$0xff]   ;;  %v1773_v41 = vshrl.u32 %v4241_v16, 16 }
  0xb1   : > { %1388 = vrot.lane.b32.xlu0 %v3620_v48, %s3712_s15  ;;  %1560 = vrot.lane.b32.xlu1 %v1481_v10, %s3715_s19  ;;  %v1209_v48 = vor.u32 %v1208_v42, %v1204_v39  ;;  %v1490_v10 = vshll.u32 %v3634_v2, 16  ;;  %v1500_v11 = vor.u32 %v1499_v4, %v1495_v3  ;;  %v4276_v39 = vld [vmem:[%s4059_s14 + $0x54] sm:$0xff]   ;;  %v1794_v42 = vrot.slane %v1792_v24, 1  ;;  %v3643_v4 = vld [vmem:[%s4059_s14 + $0x60] sm:$0xff]  }
  0xb2   : > { %3507 = vmatpush3.bf16.msra.mxu0 %v3659_v26  ;;  %v1230_v52 = vshll.u32 %v4276_v39, 16  ;;  %v1228_v56 = vshrl.u32 %v4276_v39, 16  ;;  %v1519_v18 = vshrl.u32 %v3643_v4, 16  ;;  %v4318_v26 = vld [vmem:[%s4059_s14 + $0x6c] sm:$0xff]  }
  0xb3   : > { %v1214_v58 = vsel %vm1142_vm10, %v1209_v48, %v1213_v50  ;;  %v1492_v31 = vrot.slane %v1490_v10, 1  ;;  %v1588_v50 = vsel %vm1283_vm9, %v1586_v37, %v1587_v38  ;;  %3508 = vmatprep.subr.bf16.mxu0 %v3661_v40 }
  0xb5   : > { %1558 = vrot.lane.b32.xlu0 %v1469_v1, %s3715_s19  ;;  %1610 = vrot.lane.b32.xlu1 %v1585_v19, %s3716_s26  ;;  %v1590_v1 = vrot.slane %v3633_v59, 1  ;;  %v4250_v19 = vld [vmem:[%s4059_s14 + $0x48] sm:$0xff]   ;;  %v1493_v35 = vsel %vm1142_vm10, %v1488_v25, %v1492_v31  ;;  %v1509_v25 = vshll.u32 %v3644_v13, 16 }
  0xb6   : > { %v1218_v34 = vshll.u32 %v4250_v19, 16  ;;  %v1216_v45 = vshrl.u32 %v4250_v19, 16  ;;  %3509 = vmatpush3.bf16.msra.mxu0 %v3661_v40 }
  0xb7   : > { %v1511_v24 = vrot.slane %v1509_v25, 1 }
  0xb9   : > { %1608 = vrot.lane.b32.xlu0 %v1582_v33, %s3716_s26  ;;  %1680 = vrot.lane.b32.xlu1 %v4161_v60, %s3717_s27  ;;  %v1296_v60 = vrot.slane %v4176_v9, 1  ;;  %v4269_v33 = vld [vmem:[%s4059_s14 + $0x50] ss:$0 sps:$4 sm:$0x11]   ;;  %v1512_v38 = vor.u32 %v1511_v24, %v1507_v28  ;;  %v1885_v28 = vrot.slane %v4318_v26, 1 }
  0xba   : > { %v1223_v48 = vshll.u32 %v4269_v33, 16  ;;  %v1303_v17 = vrot.slane %v4269_v33, 1  ;;  %v1811_v33 = vshll.u32 %v4318_v26, 16 }
  0xbb   : > { %v1298_v8 = vsel %vm1283_vm9, %v1296_v60, %v1297_v0  ;;  %v1876_v60 = vrot.slane %v4241_v16, 1 }
  0xbc   : > { %v1225_v55 = vrot.slane %v1223_v48, 1 }
  0xbd   : > { %1678 = vrot.lane.b32.xlu0 %v4168_v5, %s3717_s27  ;;  %1850 = vrot.lane.b32.xlu1 %v1771_v36, %s3718_s28  ;;  %v1502_v5 = vshll.u32 %v3633_v59, 16  ;;  %v1591_v36 = vsel %vm1283_vm9, %v1589_v15, %v1590_v1  ;;  %v1232_v59 = vrot.slane %v1230_v52, 1  ;;  %v1521_v15 = vshll.u32 %v3643_v4, 16 }
  0xbf   : > { %v1504_v12 = vrot.slane %v1502_v5, 1  ;;  %v1233_v2 = vor.u32 %v1232_v59, %v1228_v56  ;;  %v1879_v5 = vrot.slane %v4234_v7, 1  ;;  %v1523_v1 = vrot.slane %v1521_v15, 1 }
  0xc1   : > { %1848 = vrot.lane.b32.xlu0 %v1759_v46, %s3718_s28  ;;  %1271 = vrot.lane.b32.xlu1 %v1202_v47, %s3714_s17  ;;  %v1505_v22 = vsel %vm1142_vm10, %v1500_v11, %v1504_v12  ;;  %v1790_v46 = vor.u32 %v1789_v30, %v1785_v29  ;;  %v1220_v47 = vrot.slane %v1218_v34, 1  ;;  %v1524_v29 = vor.u32 %v1523_v1, %v1519_v18 }
  0xc2   : > { %v1528_v30 = vrot.slane %v1526_v21, 1  ;;  %v1595_v34 = vrot.slane %v3643_v4, 1 }
  0xc3   : > { %v1795_v53 = vsel %vm1142_vm10, %v1790_v46, %v1794_v42  ;;  %v4334_v42 = vld [vmem:[%s4059_s14 + $0x60] sm:$0xff]   ;;  %v1592_v46 = vrot.slane %v3644_v13, 1 }
  0xc4   : > { %v1529_v37 = vsel %vm1142_vm10, %v1524_v29, %v1528_v30 }
  0xc5   : > { %1898 = vrot.lane.b32.xlu0 %v1872_v57, %s3719_s29  ;;  %1273 = vrot.lane.b32.xlu1 %v1214_v58, %s3714_s17  ;;  %v1778_v57 = vor.u32 %v1777_v43, %v1773_v41  ;;  %v1221_v58 = vor.u32 %v1220_v47, %v1216_v45  ;;  %v1596_v41 = vrot.slane %v3645_v14, 1  ;;  %v1809_v43 = vshrl.u32 %v4318_v26, 16  ;;  %v3650_v45 = vld [vmem:[%s4059_s14 + $0x68] ss:$0 sps:$4 sm:$0x11]  }
  0xc7   : > { %v1226_v0 = vsel %vm1142_vm10, %v1221_v58, %v1225_v55  ;;  %v1597_v52 = vsel %vm1283_vm9, %v1595_v34, %v1596_v41  ;;  %v4349_v55 = vld [vmem:[%s4059_s14 + $0x6c] sm:$0xff]  }
  0xc8   : > { %v1311_v30 = vrot.slane %v4349_v55, 1  ;;  %v4387_v34 = vld [vmem:[%s4059_s14 + $0x6c] sm:$0xff]  }
  0xc9   : > { %1900 = vrot.lane.b32.xlu0 %v1875_v62, %s3719_s29  ;;  %1324 = vrot.lane.b32.xlu1 %v1301_v63, %s3713_s16  ;;  %v1877_v62 = vrot.slane %v3638_v27, 1 }
  0xcb   : > { %v1878_v10 = vsel %vm1283_vm9, %v1876_v60, %v1877_v62  ;;  %v1804_v60 = vshll.u32 %v3650_v45, 16 }
  0xcd   : > { %1322 = vrot.lane.b32.xlu0 %v1298_v8, %s3713_s16  ;;  %1394 = vrot.lane.b32.xlu1 %v3631_v51, %s3712_s15  ;;  %v3642_v51 = vld [vmem:[%s4059_s14 + $0x5c] ss:$0 sps:$4 sm:$0x11]   ;;  %v1305_v8 = vrot.slane %v4276_v39, 1 }
  0xce   : > { %v1235_v61 = vshll.u32 %v3642_v51, 16  ;;  %v1306_v12 = vrot.slane %v3642_v51, 1 }
  0xd0   : > { %v1237_v3 = vrot.slane %v1235_v61, 1  ;;  %v1307_v31 = vsel %vm1283_vm9, %v1305_v8, %v1306_v12 }
  0xd1   : > { %1392 = vrot.lane.b32.xlu0 %v4217_v54, %s3712_s15  ;;  %1564 = vrot.lane.b32.xlu1 %v1505_v22, %s3715_s19  ;;  %v1782_v54 = vrot.slane %v1780_v44, 1  ;;  %v3646_v22 = vld [vmem:[%s4059_s14 + $0x5c] ss:$0 sps:$4 sm:$0x11]   ;;  %v1813_v44 = vrot.slane %v1811_v33, 1 }
  0xd2   : > { %v1238_v11 = vsel %vm1142_vm10, %v1233_v2, %v1237_v3  ;;  %v1514_v32 = vshll.u32 %v3646_v22, 16  ;;  %v3654_v3 = vld [vmem:[%s4059_s14 + $0x74] ss:$0 sps:$4 sm:$0x11]  }
  0xd3   : > { %v1783_v63 = vsel %vm1142_vm10, %v1778_v57, %v1782_v54  ;;  %v1242_v54 = vshll.u32 %v4334_v42, 16  ;;  %v1814_v56 = vor.u32 %v1813_v44, %v1809_v43  ;;  %v1259_v15 = vshll.u32 %v3654_v3, 16 }
  0xd4   : > { %v1516_v40 = vrot.slane %v1514_v32, 1  ;;  %v1312_v33 = vrot.slane %v3654_v3, 1 }
  0xd5   : > { %1562 = vrot.lane.b32.xlu0 %v1493_v35, %s3715_s19  ;;  %1614 = vrot.lane.b32.xlu1 %v1591_v36, %s3716_s26  ;;  %v4327_v35 = vld [vmem:[%s4059_s14 + $0x60] sm:$0xff]   ;;  %v4330_v36 = vld [vmem:[%s4059_s14 + $0x74] ss:$0 sps:$4 sm:$0x11]   ;;  %v1244_v2 = vrot.slane %v1242_v54, 1  ;;  %v1261_v21 = vrot.slane %v1259_v15, 1 }
  0xd6   : > { %v1816_v47 = vshll.u32 %v4330_v36, 16  ;;  %v1799_v48 = vshll.u32 %v4327_v35, 16  ;;  %v1517_v51 = vsel %vm1142_vm10, %v1512_v38, %v1516_v40  ;;  %v1797_v57 = vshrl.u32 %v4327_v35, 16 }
  0xd7   : > { %v1886_v29 = vrot.slane %v4330_v36, 1  ;;  %v1308_v36 = vrot.slane %v4334_v42, 1  ;;  %v1313_v44 = vsel %vm1283_vm9, %v1311_v30, %v1312_v33  ;;  %v1598_v15 = vrot.slane %v4387_v34, 1 }
  0xd8   : > { %v1818_v59 = vrot.slane %v1816_v47, 1  ;;  %v1801_v61 = vrot.slane %v1799_v48, 1  ;;  %v3660_v47 = vld [vmem:[%s4059_s14 + $0x74] ss:$0 sps:$4 sm:$0x11]   ;;  %v1533_v48 = vshll.u32 %v4387_v34, 16 }
  0xd9   : > { %1612 = vrot.lane.b32.xlu0 %v1588_v50, %s3716_s26  ;;  %1684 = vrot.lane.b32.xlu1 %v4234_v7, %s3717_s27  ;;  %v1881_v7 = vsel %vm1283_vm9, %v1879_v5, %v1880_v6  ;;  %v4343_v50 = vld [vmem:[%s4059_s14 + $0x68] ss:$0 sps:$4 sm:$0x11]  }
  0xda   : > { %v1247_v62 = vshll.u32 %v4343_v50, 16  ;;  %v1819_v6 = vsel %vm1142_vm10, %v1814_v56, %v1818_v59  ;;  %v1802_v8 = vor.u32 %v1801_v61, %v1797_v57  ;;  %v1309_v41 = vrot.slane %v4343_v50, 1 }
  0xdb   : > { %v1535_v57 = vrot.slane %v1533_v48, 1  ;;  %v1538_v59 = vshll.u32 %v3660_v47, 16 }
  0xdc   : > { %v1310_v50 = vsel %vm1283_vm9, %v1308_v36, %v1309_v41 }
  0xdd   : > { %1682 = vrot.lane.b32.xlu0 %v4241_v16, %s3717_s27  ;;  %1854 = vrot.lane.b32.xlu1 %v1795_v53, %s3718_s28  ;;  %v1302_v16 = vrot.slane %v4250_v19, 1  ;;  %v1593_v53 = vrot.slane %v3646_v22, 1  ;;  %v4377_v22 = vld [vmem:[%s4059_s14 + $0x78] sm:$0xff]  }
  0xde   : > { %v1543_v43 = vshrl.u32 %v4377_v22, 16 }
  0xdf   : > { %v1304_v27 = vsel %vm1283_vm9, %v1302_v16, %v1303_v17  ;;  %v1882_v16 = vrot.slane %v4327_v35, 1  ;;  %v1883_v17 = vrot.slane %v3650_v45, 1 }
  0xe1   : > { %1852 = vrot.lane.b32.xlu0 %v1783_v63, %s3718_s28  ;;  %1275 = vrot.lane.b32.xlu1 %v1226_v0, %s3714_s17  ;;  %v1594_v63 = vsel %vm1283_vm9, %v1592_v46, %v1593_v53  ;;  %v1240_v0 = vshrl.u32 %v4334_v42, 16  ;;  %v1884_v24 = vsel %vm1283_vm9, %v1882_v16, %v1883_v17  ;;  %v1531_v53 = vshrl.u32 %v4387_v34, 16 }
  0xe2   : > { %v1599_v16 = vrot.slane %v3660_v47, 1 }
  0xe3   : > { %v1245_v12 = vor.u32 %v1244_v2, %v1240_v0  ;;  %v1601_v2 = vrot.slane %v4377_v22, 1 }
  0xe5   : > { %1902 = vrot.lane.b32.xlu0 %v1878_v10, %s3719_s29  ;;  %1277 = vrot.lane.b32.xlu1 %v1238_v11, %s3714_s17  ;;  %v1806_v10 = vrot.slane %v1804_v60, 1  ;;  %v1249_v11 = vrot.slane %v1247_v62, 1  ;;  %v4409_v62 = vld [vmem:[%s4059_s14 + $0x84] sm:$0xff]  }
  0xe7   : > { %v1807_v18 = vsel %vm1142_vm10, %v1802_v8, %v1806_v10  ;;  %v4421_v10 = vld [vmem:[%s4059_s14 + $0x78] sm:$0xff]  }
  0xe9   : > { %1904 = vrot.lane.b32.xlu0 %v1881_v7, %s3719_s29  ;;  %1328 = vrot.lane.b32.xlu1 %v1307_v31, %s3713_s16  ;;  %v1250_v31 = vsel %vm1142_vm10, %v1245_v12, %v1249_v11  ;;  %v4424_v12 = vld [vmem:[%s4059_s14 + $0x8c] ss:$0 sps:$4 sm:$0x11]  }
  0xed   : > { %1326 = vrot.lane.b32.xlu0 %v1304_v27, %s3713_s16  ;;  %1398 = vrot.lane.b32.xlu1 %v3643_v4, %s3712_s15  ;;  %v1254_v4 = vshll.u32 %v4349_v55, 16 }
  0xef   : > { %v1256_v14 = vrot.slane %v1254_v4, 1  ;;  %v1536_v4 = vor.u32 %v1535_v57, %v1531_v53  ;;  %v1891_v53 = vrot.slane %v4409_v62, 1  ;;  %v1888_v57 = vrot.slane %v4421_v10, 1 }
  0xf1   : > { %1396 = vrot.lane.b32.xlu0 %v3644_v13, %s3712_s15  ;;  %1568 = vrot.lane.b32.xlu1 %v1529_v37, %s3715_s19  ;;  %v1252_v13 = vshrl.u32 %v4349_v55, 16  ;;  %v1545_v37 = vshll.u32 %v4377_v22, 16 }
  0xf3   : > { %v1257_v1 = vor.u32 %v1256_v14, %v1252_v13  ;;  %v1547_v45 = vrot.slane %v1545_v37, 1 }
  0xf5   : > { %1566 = vrot.lane.b32.xlu0 %v1517_v51, %s3715_s19  ;;  %1618 = vrot.lane.b32.xlu1 %v1597_v52, %s3716_s26  ;;  %v1262_v32 = vsel %vm1142_vm10, %v1257_v1, %v1261_v21  ;;  %v1548_v54 = vor.u32 %v1547_v45, %v1543_v43  ;;  %v1823_v1 = vshll.u32 %v4421_v10, 16 }
  0xf7   : > { %v4354_v58 = vpop.permute.xlu1 %1386  ;;  %v4364_v5 = vpop.permute.xlu0 %1384 }
  0xf9   : > { %1616 = vrot.lane.b32.xlu0 %v1594_v63, %s3716_s26  ;;  %1688 = vrot.lane.b32.xlu1 %v4318_v26, %s3717_s27  ;;  %v1887_v26 = vsel %vm1283_vm9, %v1885_v28, %v1886_v29  ;;  %v1840_v29 = vshll.u32 %v4424_v12, 16 }
  0xfb   : > { %v4368_v7 = vpop.permute.xlu1 %1314  ;;  %v1842_v41 = vrot.slane %v1840_v29, 1 }
  0xfd   : > { %1686 = vrot.lane.b32.xlu0 %v4327_v35, %s3717_s27  ;;  %1858 = vrot.lane.b32.xlu1 %v1819_v6, %s3718_s28  ;;  %v3658_v35 = vld [vmem:[%s4059_s14 + $0x80] ss:$0 sps:$4 sm:$0x11]   ;;  %v1540_v6 = vrot.slane %v1538_v59, 1 }
  0xfe   : > { %v1550_v46 = vshll.u32 %v3658_v35, 16  ;;  %v1602_v8 = vrot.slane %v3658_v35, 1 }
  0xff   : > { %v1264_v25 = vpop.permute.xlu0 %1263  ;;  %v1317_v27 = vpop.permute.xlu1 %1316  ;;  %v1541_v17 = vsel %vm1142_vm10, %v1536_v4, %v1540_v6 }
 0x100   : > { %v1552_v56 = vrot.slane %v1550_v46, 1  ;;  %v1916_v63 = vsel %vm1914_vm12, %v4072_v49, %v1264_v25 }
 0x101   : > { %1856 = vrot.lane.b32.xlu0 %v1807_v18, %s3718_s28  ;;  %1279 = vrot.lane.b32.xlu1 %v1250_v31, %s3714_s17  ;;  %v1937_v13 = vsel %vm1935_vm13, %v1916_v63, %v4368_v7  ;;  %v1603_v18 = vsel %vm1283_vm9, %v1601_v2, %v1602_v8  ;;  %v1833_v31 = vshrl.u32 %v4409_v62, 16  ;;  %v3665_v7 = vld [vmem:[%s4059_s14 + $0x80] ss:$0 sps:$4 sm:$0x11]  }
 0x102   : > { %v1553_v3 = vsel %vm1142_vm10, %v1548_v54, %v1552_v56  ;;  %v1828_v35 = vshll.u32 %v3665_v7, 16  ;;  %v1889_v59 = vrot.slane %v3665_v7, 1 }
 0x103   : > { %v1266_v38 = vpop.permute.xlu0 %1265  ;;  %v4391_v40 = vpop.permute.xlu1 %1556 }
 0x104   : > { %v1918_v0 = vsel %vm1914_vm12, %v4076_v20, %v1266_v38  ;;  %v1835_v20 = vshll.u32 %v4409_v62, 16  ;;  %v1830_v46 = vrot.slane %v1828_v35, 1  ;;  %v1890_v63 = vsel %vm1283_vm9, %v1888_v57, %v1889_v59 }
 0x105   : > { %1906 = vrot.lane.b32.xlu0 %v1884_v24, %s3719_s29  ;;  %1281 = vrot.lane.b32.xlu1 %v1262_v32, %s3714_s17  ;;  %v1939_v14 = vsel %vm1935_vm13, %v1918_v0, %v1317_v27 }
 0x106   : > { %v1960_v21 = vsel %vm1956_vm14, %v1939_v14, %v4354_v58  ;;  %v1837_v28 = vrot.slane %v1835_v20, 1  ;;  %v1600_v58 = vsel %vm1283_vm9, %v1598_v15, %v1599_v16  ;;  %v3670_v20 = vld [vmem:[%s4059_s14 + $0x24] sm:$0xff]  }
 0x107   : > { %v1555_v51 = vpop.permute.xlu0 %1554  ;;  %v4402_v52 = vpop.permute.xlu1 %1606  ;;  %v1981_v32 = vsel %vm1977_vm15, %v1960_v21, %v4391_v40 }
 0x108   : > { %v1838_v36 = vor.u32 %v1837_v28, %v1833_v31 }
 0x109   : > { %1908 = vrot.lane.b32.xlu0 %v1887_v26, %s3719_s29  ;;  %1332 = vrot.lane.b32.xlu1 %v1313_v44, %s3713_s16  ;;  %v2002_v44 = vsel %vm4972_vm0, %v1981_v32, %v4402_v52  ;;  %v1892_v52 = vrot.slane %v4424_v12, 1 }
 0x10b   : > { %v1605_v61 = vpop.permute.xlu0 %1604  ;;  %v1677_v60 = vpop.permute.xlu1 %1676 }
 0x10c   : > { %v2023_v40 = vsel %vm4971_vm1, %v2002_v44, %v1677_v60 }
 0x10d   : > { %1330 = vrot.lane.b32.xlu0 %v1310_v50, %s3713_s16  ;;  %1402 = vrot.lane.b32.xlu1 %v4377_v22, %s3712_s15  ;;  %v1958_v22 = vsel %vm1956_vm14, %v1937_v13, %v4364_v5  ;;  %v1821_v5 = vshrl.u32 %v4421_v10, 16  ;;  %v1843_v50 = vsel %vm1142_vm10, %v1838_v36, %v1842_v41 }
 0x10e   : > { %v1979_v30 = vsel %vm1977_vm15, %v1958_v22, %v1555_v51 }
 0x10f   : > { %v1675_v11 = vpop.permute.xlu0 %1674  ;;  %v1847_v49 = vpop.permute.xlu1 %1846  ;;  %v2000_v24 = vsel %vm4972_vm0, %v1979_v30, %v1605_v61 }
 0x110   : > { %v2021_v33 = vsel %vm4971_vm1, %v2000_v24, %v1675_v11  ;;  %v2044_v47 = vsel %vm4970_vm2, %v2023_v40, %v1847_v49  ;;  %v3669_v49 = vld [vmem:[%s4059_s14 + $0x18] sm:$0xff]  }
 0x111   : > { %1400 = vrot.lane.b32.xlu0 %v4387_v34, %s3712_s15  ;;  %1572 = vrot.lane.b32.xlu1 %v1553_v3, %s3715_s19  ;;  %v1825_v34 = vrot.slane %v1823_v1, 1 }
 0x113   : > { %v1845_v25 = vpop.permute.xlu0 %1844  ;;  %v1268_v27 = vpop.permute.xlu1 %1267  ;;  %v1826_v45 = vor.u32 %v1825_v34, %v1821_v5 }
 0x114   : > { %v2042_v37 = vsel %vm4970_vm2, %v2021_v33, %v1845_v25  ;;  %v1920_v12 = vsel %vm1914_vm12, %v3669_v49, %v1268_v27 }
 0x115   : > { %1570 = vrot.lane.b32.xlu0 %v1541_v17, %s3715_s19  ;;  %1622 = vrot.lane.b32.xlu1 %v1603_v18, %s3716_s26  ;;  %v1831_v56 = vsel %vm1142_vm10, %v1826_v45, %v1830_v46 }
 0x117   : > { %v1895_v38 = vpop.permute.xlu0 %1894  ;;  %v1270_v26 = vpop.permute.xlu1 %1269 }
 0x118   : > { %v2063_v43 = vsel %vm4969_vm3, %v2042_v37, %v1895_v38  ;;  %v1922_v13 = vsel %vm1914_vm12, %v3670_v20, %v1270_v26 }
 0x119   : > { %1620 = vrot.lane.b32.xlu0 %v1600_v58, %s3716_s26  ;;  %3510 = vmatprep.mubr.msk.bf16.mxu0 %vm4968_vm4, %v2063_v43 }
 0x11a   : > { %1692 = vrot.lane.b32.xlu1 %v4409_v62, %s3717_s27  ;;  %v1893_v62 = vsel %vm1283_vm9, %v1891_v53, %v1892_v52 }
 0x11b   : > { %v1897_v48 = vpop.permute.xlu0 %1896  ;;  %v1321_v51 = vpop.permute.xlu1 %1320 }
 0x11c   : > { %v2065_v54 = vsel %vm4969_vm3, %v2044_v47, %v1897_v48  ;;  %v1943_v18 = vsel %vm1935_vm13, %v1922_v13, %v1321_v51 }
 0x11d   : > { %1690 = vrot.lane.b32.xlu0 %v4421_v10, %s3717_s27  ;;  %3511 = vmatmul.mubr.msk.bf16.vlgmr.msra.gmra.mxu0 %vm4968_vm4, %v2065_v54 }
 0x11e   : > { %1862 = vrot.lane.b32.xlu1 %v1843_v50, %s3718_s28 }
 0x11f   : > { %v1319_v61 = vpop.permute.xlu0 %1318  ;;  %v1391_v60 = vpop.permute.xlu1 %1390 }
 0x120   : > { %v1941_v14 = vsel %vm1935_vm13, %v1920_v12, %v1319_v61  ;;  %v1964_v21 = vsel %vm1956_vm14, %v1943_v18, %v1391_v60 }
 0x121   : > { %1860 = vrot.lane.b32.xlu0 %v1831_v56, %s3718_s28 }
 0x122   : > { %1912 = vrot.lane.b32.xlu1 %v1893_v62, %s3719_s29 }
 0x123   : > { %v1389_v0 = vpop.permute.xlu0 %1388  ;;  %v1561_v2 = vpop.permute.xlu1 %1560 }
 0x124   : > { %v1962_v15 = vsel %vm1956_vm14, %v1941_v14, %v1389_v0  ;;  %v1985_v28 = vsel %vm1977_vm15, %v1964_v21, %v1561_v2 }
 0x125   : > { %1910 = vrot.lane.b32.xlu0 %v1890_v63, %s3719_s29 }
 0x127   : > { %v1559_v3 = vpop.permute.xlu0 %1558  ;;  %v1611_v4 = vpop.permute.xlu1 %1610 }
 0x128   : > { %v1983_v31 = vsel %vm1977_vm15, %v1962_v15, %v1559_v3  ;;  %v2006_v30 = vsel %vm4972_vm0, %v1985_v28, %v1611_v4 }
 0x12b   : > { %v1609_v6 = vpop.permute.xlu0 %1608  ;;  %v1681_v8 = vpop.permute.xlu1 %1680 }
 0x12c   : > { %v2004_v7 = vsel %vm4972_vm0, %v1983_v31, %v1609_v6  ;;  %v2027_v24 = vsel %vm4971_vm1, %v2006_v30, %v1681_v8 }
 0x12f   : > { %v1679_v10 = vpop.permute.xlu0 %1678  ;;  %v1851_v11 = vpop.permute.xlu1 %1850 }
 0x130   : > { %v2025_v1 = vsel %vm4971_vm1, %v2004_v7, %v1679_v10  ;;  %v2048_v58 = vsel %vm4970_vm2, %v2027_v24, %v1851_v11 }
 0x133   : > { %v1849_v16 = vpop.permute.xlu0 %1848  ;;  %v1272_v17 = vpop.permute.xlu1 %1271 }
 0x134   : > { %v2046_v22 = vsel %vm4970_vm2, %v2025_v1, %v1849_v16  ;;  %v1924_v45 = vsel %vm1914_vm12, %v4176_v9, %v1272_v17 }
 0x137   : > { %v1899_v25 = vpop.permute.xlu0 %1898  ;;  %v1274_v27 = vpop.permute.xlu1 %1273 }
 0x138   : > { %v2067_v29 = vsel %vm4969_vm3, %v2046_v22, %v1899_v25  ;;  %v1926_v46 = vsel %vm1914_vm12, %v4192_v23, %v1274_v27 }
 0x139   : > { %3514 = vmatprep.mubr.msk.bf16.mxu0 %vm4968_vm4, %v2067_v29 }
 0x13b   : > { %v1901_v5 = vpop.permute.xlu0 %1900  ;;  %v1325_v32 = vpop.permute.xlu1 %1324 }
 0x13c   : > { %v2069_v33 = vsel %vm4969_vm3, %v2048_v58, %v1901_v5  ;;  %v1947_v53 = vsel %vm1935_vm13, %v1926_v46, %v1325_v32 }
 0x13d   : > { %3515 = vmatmul.mubr.msk.bf16.gmra.mxu0 %vm4968_vm4, %v2069_v33 }
 0x13f   : > { %v1323_v34 = vpop.permute.xlu0 %1322  ;;  %v1395_v35 = vpop.permute.xlu1 %1394 }
 0x140   : > { %v1945_v47 = vsel %vm1935_vm13, %v1924_v45, %v1323_v34  ;;  %v1968_v57 = vsel %vm1956_vm14, %v1947_v53, %v1395_v35 }
 0x143   : > { %v1393_v37 = vpop.permute.xlu0 %1392  ;;  %v1565_v38 = vpop.permute.xlu1 %1564 }
 0x144   : > { %v1966_v48 = vsel %vm1956_vm14, %v1945_v47, %v1393_v37  ;;  %v1989_v61 = vsel %vm1977_vm15, %v1968_v57, %v1565_v38 }
 0x147   : > { %v1563_v26 = vpop.permute.xlu0 %1562  ;;  %v1615_v36 = vpop.permute.xlu1 %1614 }
 0x148   : > { %v1987_v52 = vsel %vm1977_vm15, %v1966_v48, %v1563_v26  ;;  %v2010_v62 = vsel %vm4972_vm0, %v1989_v61, %v1615_v36 }
 0x14b   : > { %v1613_v41 = vpop.permute.xlu0 %1612  ;;  %v1685_v43 = vpop.permute.xlu1 %1684 }
 0x14c   : > { %v2008_v54 = vsel %vm4972_vm0, %v1987_v52, %v1613_v41  ;;  %v2031_v63 = vsel %vm4971_vm1, %v2010_v62, %v1685_v43 }
 0x14f   : > { %v1683_v44 = vpop.permute.xlu0 %1682  ;;  %v1855_v40 = vpop.permute.xlu1 %1854 }
 0x150   : > { %v2029_v56 = vsel %vm4971_vm1, %v2008_v54, %v1683_v44  ;;  %v2052_v0 = vsel %vm4970_vm2, %v2031_v63, %v1855_v40 }
 0x153   : > { %v1853_v51 = vpop.permute.xlu0 %1852  ;;  %v1276_v50 = vpop.permute.xlu1 %1275 }
 0x154   : > { %v2050_v9 = vsel %vm4970_vm2, %v2029_v56, %v1853_v51  ;;  %v1928_v16 = vsel %vm1914_vm12, %v4250_v19, %v1276_v50 }
 0x157   : > { %v1903_v59 = vpop.permute.xlu0 %1902  ;;  %v1278_v23 = vpop.permute.xlu1 %1277 }
 0x158   : > { %v2071_v60 = vsel %vm4969_vm3, %v2050_v9, %v1903_v59  ;;  %v1930_v17 = vsel %vm1914_vm12, %v4276_v39, %v1278_v23 }
 0x159   : > { %3518 = vmatprep.mubr.msk.bf16.mxu0 %vm4968_vm4, %v2071_v60 }
 0x15b   : > { %v1905_v2 = vpop.permute.xlu0 %1904  ;;  %v1329_v3 = vpop.permute.xlu1 %1328 }
 0x15c   : > { %v2073_v4 = vsel %vm4969_vm3, %v2052_v0, %v1905_v2  ;;  %v1951_v21 = vsel %vm1935_vm13, %v1930_v17, %v1329_v3  ;;  %v4559_v2 = vstv %s3429_s13  ;;  %v4564_v3 = vld [vmem:[%s4964_s2] ss:$0 sm:$0xff] }
 0x15d   : > { %3519 = vmatmul.mubr.msk.bf16.gmra.mxu0 %vm4968_vm4, %v2073_v4  ;;  %v2289_v4 = vadd.s32 1, %v4559_v2  ;;  %vm2298_vm7 = vcmp.ge.s32.totalorder %v4559_v2, 0  ;;  %vm2308_vm8 = vcmp.lt.s32.totalorder %v4559_v2, 16 }
 0x15f   : > { %v1327_v6 = vpop.permute.xlu0 %1326  ;;  %v1399_v8 = vpop.permute.xlu1 %1398  ;;  %vm2299_vm5 = vcmp.ge.s32.totalorder %v2289_v4, 0  ;;  %vm2309_vm6 = vcmp.lt.s32.totalorder %v2289_v4, 16 }
 0x160   : > { %v1949_v18 = vsel %vm1935_vm13, %v1928_v16, %v1327_v6  ;;  %v1972_v28 = vsel %vm1956_vm14, %v1951_v21, %v1399_v8 }
 0x163   : > { %v1397_v10 = vpop.permute.xlu0 %1396  ;;  %v1569_v11 = vpop.permute.xlu1 %1568 }
 0x164   : > { %v1970_v31 = vsel %vm1956_vm14, %v1949_v18, %v1397_v10  ;;  %v1993_v30 = vsel %vm1977_vm15, %v1972_v28, %v1569_v11 }
 0x167   : > { %v1567_v49 = vpop.permute.xlu0 %1566  ;;  %v1619_v12 = vpop.permute.xlu1 %1618 }
 0x168   : > { %v1991_v22 = vsel %vm1977_vm15, %v1970_v31, %v1567_v49  ;;  %v2014_v58 = vsel %vm4972_vm0, %v1993_v30, %v1619_v12 }
 0x16b   : > { %v1617_v20 = vpop.permute.xlu0 %1616  ;;  %v1689_v13 = vpop.permute.xlu1 %1688 }
 0x16c   : > { %v2012_v25 = vsel %vm4972_vm0, %v1991_v22, %v1617_v20  ;;  %v2035_v5 = vsel %vm4971_vm1, %v2014_v58, %v1689_v13 }
 0x16f   : > { %v1687_v14 = vpop.permute.xlu0 %1686  ;;  %v1859_v15 = vpop.permute.xlu1 %1858 }
 0x170   : > { %v2033_v27 = vsel %vm4971_vm1, %v2012_v25, %v1687_v14  ;;  %v2056_v32 = vsel %vm4970_vm2, %v2035_v5, %v1859_v15 }
 0x173   : > { %v1857_v7 = vpop.permute.xlu0 %1856  ;;  %v1280_v1 = vpop.permute.xlu1 %1279 }
 0x174   : > { %v2054_v19 = vsel %vm4970_vm2, %v2033_v27, %v1857_v7  ;;  %v1932_v48 = vsel %vm1914_vm12, %v4334_v42, %v1280_v1 }
 0x177   : > { %v1907_v29 = vpop.permute.xlu0 %1906  ;;  %v1282_v39 = vpop.permute.xlu1 %1281 }
 0x178   : > { %v2075_v24 = vsel %vm4969_vm3, %v2054_v19, %v1907_v29  ;;  %v1934_v45 = vsel %vm1914_vm12, %v4349_v55, %v1282_v39 }
 0x179   : > { %3522 = vmatprep.mubr.msk.bf16.mxu0 %vm4968_vm4, %v2075_v24 }
 0x17b   : > { %v1909_v33 = vpop.permute.xlu0 %1908  ;;  %v1333_v34 = vpop.permute.xlu1 %1332 }
 0x17c   : > { %v2077_v35 = vsel %vm4969_vm3, %v2056_v32, %v1909_v33  ;;  %v1955_v51 = vsel %vm1935_vm13, %v1934_v45, %v1333_v34 }
 0x17d   : > { %3523 = vmatmul.mubr.msk.bf16.gmra.mxu0 %vm4968_vm4, %v2077_v35 }
 0x17f   : > { %v1331_v37 = vpop.permute.xlu0 %1330  ;;  %v1403_v38 = vpop.permute.xlu1 %1402 }
 0x180   : > { %v1953_v50 = vsel %vm1935_vm13, %v1932_v48, %v1331_v37  ;;  %v1976_v54 = vsel %vm1956_vm14, %v1955_v51, %v1403_v38  ;;  %v2291_v51 = vadd.s32 3, %v4559_v2 }
 0x183   : > { %v1401_v26 = vpop.permute.xlu0 %1400  ;;  %v1573_v36 = vpop.permute.xlu1 %1572 }
 0x184   : > { %v1974_v53 = vsel %vm1956_vm14, %v1953_v50, %v1401_v26  ;;  %v1997_v57 = vsel %vm1977_vm15, %v1976_v54, %v1573_v36 }
 0x187   : > { %v1571_v41 = vpop.permute.xlu0 %1570  ;;  %v1623_v43 = vpop.permute.xlu1 %1622 }
 0x188   : > { %v1995_v56 = vsel %vm1977_vm15, %v1974_v53, %v1571_v41  ;;  %v2018_v9 = vsel %vm4972_vm0, %v1997_v57, %v1623_v43 }
 0x18b   : > { %v1621_v44 = vpop.permute.xlu0 %1620 }
 0x18c   : > { %v1693_v40 = vpop.permute.xlu1 %1692  ;;  %v2016_v55 = vsel %vm4972_vm0, %v1995_v56, %v1621_v44 }
 0x18d   : > { %v2039_v23 = vsel %vm4971_vm1, %v2018_v9, %v1693_v40 }
 0x18f   : > { %v1691_v46 = vpop.permute.xlu0 %1690 }
 0x190   : > { %v1863_v47 = vpop.permute.xlu1 %1862  ;;  %v2037_v42 = vsel %vm4971_vm1, %v2016_v55, %v1691_v46  ;;  %vm2469_vm1 = vsmask.f32 256 }
 0x191   : > { %v2060_v62 = vsel %vm4970_vm2, %v2039_v23, %v1863_v47 }
 0x193   : > { %v1861_v52 = vpop.permute.xlu0 %1860 }
 0x194   : > { %v1913_v59 = vpop.permute.xlu1 %1912  ;;  %v2058_v61 = vsel %vm4970_vm2, %v2037_v42, %v1861_v52  ;;  %vm2468_vm2 = vcmask 1040384   ;;  %v2290_v52 = vadd.s32 2, %v4559_v2 }
 0x195   : > { %v2081_v0 = vsel %vm4969_vm3, %v2060_v62, %v1913_v59  ;;  %vm4573_vm0 = vmand %vm2468_vm2, %vm2469_vm1  ;;  %vm2301_vm1 = vcmp.ge.s32.totalorder %v2291_v51, 0  ;;  %vm2311_vm2 = vcmp.lt.s32.totalorder %v2291_v51, 16 }
 0x197   : > { %v1911_v60 = vpop.permute.xlu0 %1910 }
 0x198   : > { %v2079_v63 = vsel %vm4969_vm3, %v2058_v61, %v1911_v60  ;;  %vm2318_vm3 = vmand %vm2298_vm7, %vm2308_vm8 }
 0x199   : > { %3526 = vmatprep.mubr.msk.bf16.mxu0 %vm4968_vm4, %v2079_v63 }
 0x19a   : > { %3527 = vmatmul.mubr.msk.bf16.gmra.mxu0 %vm4968_vm4, %v2081_v0  ;;  %vm2319_vm4 = vmand %vm2299_vm5, %vm2309_vm6 }
 0x19b   : > { %vm2321_vm5 = vmand %vm2301_vm1, %vm2311_vm2 }
 0x1dd   : > { %v3512_v6 = vpop.f32.mrf.mxu0 }
 0x1de   : > { %v2249_v8 = vadd.f32 %v3512_v6, %v4564_v3 }
 0x1df   : > { %v2161_v10 = vpop.f32.mrf.mxu0 }
 0x1e0   : > { %v2247_v11 = vadd.f32 %v4564_v3, %v2161_v10  ;;  %v2269_v12 = vmax.f32 %v2249_v8, 0.0 }
 0x1e1   : > { %v3513_v49 = vpop.f32.mrf.mxu0 }
 0x1e2   : > { %v2250_v20 = vadd.f32 %v3513_v49, %v4564_v3  ;;  %v2267_v14 = vmax.f32 %v2247_v11, 0.0  ;;  %v2350_v17 = vsel %vm2319_vm4, %v2269_v12, 0.0 }
 0x1e3   : > { %v2164_v13 = vpop.f32.mrf.mxu0 }
 0x1e4   : > { %v2270_v15 = vmax.f32 %v2250_v20, 0.0  ;;  %v2248_v16 = vadd.f32 %v4564_v3, %v2164_v13  ;;  %v2348_v1 = vsel %vm2318_vm3, %v2267_v14, 0.0 }
 0x1e6   : > { %v2351_v18 = vsel %vm2319_vm4, %v2270_v15, 0.0  ;;  %v2268_v31 = vmax.f32 %v2248_v16, 0.0  ;;  %vm2310_vm4 = vcmp.lt.s32.totalorder %v2290_v52, 16 }
 0x1e7   : > { %v2369_v7 = vpack.c.bf16 %v2351_v18, %v2350_v17 }
 0x1e8   : > { %v2349_v21 = vsel %vm2318_vm3, %v2268_v31, 0.0  ;;  %vm2300_vm3 = vcmp.ge.s32.totalorder %v2290_v52, 0 }
 0x1e9   : > { %v2386_v22 = vshrl.u32 %v2369_v7, 16  ;;  %v2368_v25 = vpack.c.bf16 %v2349_v21, %v2348_v1  ;;  %v2389_v19 = vshll.u32 %v2369_v7, 16  ;;  %vm2320_vm6 = vmand %vm2300_vm3, %vm2310_vm4 }
 0x1eb   : > { %v2388_v28 = vrot.slane %v2386_v22, 7  ;;  %v2379_v29 = vshrl.u32 %v2368_v25, 16  ;;  %v2382_v30 = vshll.u32 %v2368_v25, 16 }
 0x1ed   : > { %v2381_v39 = vrot.slane %v2379_v29, 7  ;;  %v2391_v24 = vor.u32 %v2389_v19, %v2388_v28  ;;  %v2482_v58 = vsel %vm4573_vm0, %v2388_v28, 0 }
 0x1ee   : > { %v2623_v34 = vrot.slane %v2482_v58, 1  ;;  %v2511_v37 = vshll.u32 %v2482_v58, 16 }
 0x1ef   : > { %v2384_v5 = vor.u32 %v2382_v30, %v2381_v39  ;;  %v4581_v32 = vsel %vm4573_vm0, 0, %v2391_v24  ;;  %v2481_v43 = vsel %vm4573_vm0, %v2381_v39, 0 }
 0x1f0   : > { %2660 = vrot.lane.b32.xlu0 %v4581_v32, %s3712_s15  ;;  %v2622_v33 = vrot.slane %v4581_v32, 1  ;;  %v2506_v35 = vshll.u32 %v4581_v32, 16  ;;  %v2504_v36 = vshrl.u32 %v4581_v32, 16  ;;  %v2513_v45 = vrot.slane %v2511_v37, 1 }
 0x1f1   : > { %v4589_v38 = vsel %vm4573_vm0, 0, %v2384_v5  ;;  %v2620_v46 = vrot.slane %v2481_v43, 1  ;;  %v2499_v14 = vshll.u32 %v2481_v43, 16 }
 0x1f2   : > { %v2624_v26 = vsel %vm1283_vm9, %v2622_v33, %v2623_v34  ;;  %v2508_v41 = vrot.slane %v2506_v35, 1  ;;  %v2619_v44 = vrot.slane %v4589_v38, 1  ;;  %v2494_v4 = vshll.u32 %v4589_v38, 16 }
 0x1f3   : > { %2645 = vrot.lane.b32.xlu1 %v2624_v26, %s3713_s16  ;;  %v2492_v18 = vshrl.u32 %v4589_v38, 16  ;;  %v2501_v21 = vrot.slane %v2499_v14, 1 }
 0x1f4   : > { %2708 = vrot.lane.b32.xlu0 %v2624_v26, %s3716_s26  ;;  %v2509_v40 = vor.u32 %v2508_v41, %v2504_v36  ;;  %v2621_v48 = vsel %vm1283_vm9, %v2619_v44, %v2620_v46  ;;  %v2496_v13 = vrot.slane %v2494_v4, 1  ;;  %v2293_v36 = vadd.s32 5, %v4559_v2 }
 0x1f6   : > { %v2514_v47 = vsel %vm1142_vm10, %v2509_v40, %v2513_v45  ;;  %v2497_v1 = vor.u32 %v2496_v13, %v2492_v18  ;;  %v2292_v40 = vadd.s32 4, %v4559_v2  ;;  %v3666_v45 = vld [vmem:[%s4965_s3 + $0x10] ss:$0 sps:$4 sm:$0x33]   ;;  %vm2303_vm7 = vcmp.ge.s32.totalorder %v2293_v36, 0 }
 0x1f7   : > { %2589 = vrot.lane.b32.xlu1 %v2514_v47, %s3714_s17  ;;  %vm2313_vm8 = vcmp.lt.s32.totalorder %v2293_v36, 16  ;;  %v2954_v51 = vsel %vm2123_vm11, %v3666_v45, 0  ;;  %3553 = vmatprep.subr.msk.bf16.mxu1 %vm2123_vm11, %v3666_v45 }
 0x1f8   : > { %2643 = vrot.lane.b32.xlu0 %v2621_v48, %s3713_s16  ;;  %v2502_v25 = vsel %vm1142_vm10, %v2497_v1, %v2501_v21  ;;  %vm2302_vm1 = vcmp.ge.s32.totalorder %v2292_v40, 0  ;;  %vm2312_vm2 = vcmp.lt.s32.totalorder %v2292_v40, 16  ;;  %3531 = vmatpush3.bf16.msra.mxu1 %v2954_v51  ;;  %vm2323_vm3 = vmand %vm2303_vm7, %vm2313_vm8 }
 0x1f9   : > { %vm2322_vm11 = vmand %vm2302_vm1, %vm2312_vm2 }
 0x1fc   : > { %2688 = vrot.lane.b32.xlu0 %v2514_v47, %s3715_s19 }
 0x1fd   : > { %v3516_v50 = vpop.f32.mrf.mxu0 }
 0x1fe   : > { %v2253_v53 = vadd.f32 %v3516_v50, %v4564_v3 }
 0x1ff   : > { %v2177_v54 = vpop.f32.mrf.mxu0 }
 0x200   : > { %v2251_v56 = vadd.f32 %v4564_v3, %v2177_v54  ;;  %v2273_v55 = vmax.f32 %v2253_v53, 0.0  ;;  %v3667_v54 = vld [vmem:[%s4965_s3 + $0x8] sm:$0xff]  }
 0x201   : > { %v3517_v57 = vpop.f32.mrf.mxu0  ;;  %3532 = vmatprep.subr.bf16.mxu1 %v3667_v54 }
 0x202   : > { %v2254_v9 = vadd.f32 %v3517_v57, %v4564_v3  ;;  %v2271_v59 = vmax.f32 %v2251_v56, 0.0  ;;  %v2354_v60 = vsel %vm2321_vm5, %v2273_v55, 0.0  ;;  %3533 = vmatpush3.bf16.msra.mxu1 %v3667_v54 }
 0x203   : > { %v2180_v42 = vpop.f32.mrf.mxu0 }
 0x204   : > { %v2274_v23 = vmax.f32 %v2254_v9, 0.0  ;;  %v2252_v61 = vadd.f32 %v4564_v3, %v2180_v42  ;;  %v2352_v6 = vsel %vm2320_vm6, %v2271_v59, 0.0 }
 0x206   : > { %v2355_v62 = vsel %vm2321_vm5, %v2274_v23, 0.0  ;;  %v2272_v63 = vmax.f32 %v2252_v61, 0.0 }
 0x207   : > { %v2371_v0 = vpack.c.bf16 %v2355_v62, %v2354_v60  ;;  %v3668_v62 = vld [vmem:[%s4965_s3] sm:$0xff]  }
 0x208   : > { %v2353_v8 = vsel %vm2320_vm6, %v2272_v63, 0.0  ;;  %3534 = vmatprep.subr.bf16.mxu1 %v3668_v62 }
 0x209   : > { %v2400_v10 = vshrl.u32 %v2371_v0, 16  ;;  %v2370_v11 = vpack.c.bf16 %v2353_v8, %v2352_v6  ;;  %v2403_v12 = vshll.u32 %v2371_v0, 16  ;;  %3535 = vmatpush3.bf16.msra.mxu1 %v3668_v62 }
 0x20b   : > { %v2402_v49 = vrot.slane %v2400_v10, 7  ;;  %v2393_v20 = vshrl.u32 %v2370_v11, 16  ;;  %v2396_v17 = vshll.u32 %v2370_v11, 16 }
 0x20d   : > { %v2405_v15 = vor.u32 %v2403_v12, %v2402_v49  ;;  %v2395_v16 = vrot.slane %v2393_v20, 7  ;;  %v2484_v22 = vsel %vm4573_vm0, %v2402_v49, 0 }
 0x20e   : > { %v2629_v39 = vrot.slane %v2484_v22, 1  ;;  %v2535_v35 = vshll.u32 %v2484_v22, 16 }
 0x20f   : > { %v2398_v31 = vor.u32 %v2396_v17, %v2395_v16  ;;  %v4613_v7 = vsel %vm4573_vm0, 0, %v2405_v15  ;;  %v4633_v30 = vsel %vm4573_vm0, %v2395_v16, 0 }
 0x210   : > { %2664 = vrot.lane.b32.xlu0 %v4613_v7, %s3712_s15  ;;  %2727 = vrot.lane.b32.xlu1 %v4613_v7, %s3717_s27  ;;  %v2628_v19 = vrot.slane %v4613_v7, 1  ;;  %v2530_v29 = vshll.u32 %v4613_v7, 16  ;;  %v2626_v33 = vrot.slane %v4633_v30, 1  ;;  %v2528_v34 = vshrl.u32 %v4613_v7, 16 }
 0x211   : > { %v4624_v28 = vsel %vm4573_vm0, 0, %v2398_v31  ;;  %v2537_v43 = vrot.slane %v2535_v35, 1  ;;  %v2523_v12 = vshll.u32 %v4633_v30, 16  ;;  %v2295_v30 = vadd.s32 7, %v4559_v2 }
 0x212   : > { %v2630_v24 = vsel %vm1283_vm9, %v2628_v19, %v2629_v39  ;;  %v2625_v58 = vrot.slane %v4624_v28, 1  ;;  %v2532_v5 = vrot.slane %v2530_v29, 1  ;;  %v2518_v60 = vshll.u32 %v4624_v28, 16 }
 0x213   : > { %v2516_v13 = vshrl.u32 %v4624_v28, 16  ;;  %v2525_v18 = vrot.slane %v2523_v12, 1  ;;  %vm2305_vm4 = vcmp.ge.s32.totalorder %v2295_v30, 0  ;;  %vm2315_vm5 = vcmp.lt.s32.totalorder %v2295_v30, 16 }
 0x214   : > { %2587 = vrot.lane.b32.xlu0 %v2502_v25, %s3714_s17  ;;  %2662 = vrot.lane.b32.xlu1 %v4624_v28, %s3712_s15  ;;  %v2627_v37 = vsel %vm1283_vm9, %v2625_v58, %v2626_v33  ;;  %v2533_v26 = vor.u32 %v2532_v5, %v2528_v34  ;;  %v2520_v49 = vrot.slane %v2518_v60, 1  ;;  %v2294_v33 = vadd.s32 6, %v4559_v2  ;;  %vm2325_vm8 = vmand %vm2305_vm4, %vm2315_vm5 }
 0x216   : > { %v2538_v47 = vsel %vm1142_vm10, %v2533_v26, %v2537_v43  ;;  %v2521_v16 = vor.u32 %v2520_v49, %v2516_v13  ;;  %vm2304_vm6 = vcmp.ge.s32.totalorder %v2294_v33, 0  ;;  %vm2314_vm7 = vcmp.lt.s32.totalorder %v2294_v33, 16 }
 0x217   : > { %vm2324_vm1 = vmand %vm2304_vm6, %vm2314_vm7 }
 0x218   : > { %2725 = vrot.lane.b32.xlu0 %v4624_v28, %s3717_s27  ;;  %2649 = vrot.lane.b32.xlu1 %v2630_v24, %s3713_s16  ;;  %v2526_v1 = vsel %vm1142_vm10, %v2521_v16, %v2525_v18 }
 0x21c   : > { %2775 = vrot.lane.b32.xlu0 %v2630_v24, %s3719_s29  ;;  %2710 = vrot.lane.b32.xlu1 %v2627_v37, %s3716_s26 }
 0x21d   : > { %v3520_v41 = vpop.f32.mrf.mxu0 }
 0x21e   : > { %v2257_v44 = vadd.f32 %v3520_v41, %v4564_v3 }
 0x21f   : > { %v2193_v46 = vpop.f32.mrf.mxu0 }
 0x220   : > { %v2255_v48 = vadd.f32 %v4564_v3, %v2193_v46  ;;  %2712 = vrot.lane.b32.xlu0 %v2630_v24, %s3716_s26  ;;  %2755 = vrot.lane.b32.xlu1 %v2538_v47, %s3718_s28  ;;  %v2277_v53 = vmax.f32 %v2257_v44, 0.0 }
 0x221   : > { %v3521_v50 = vpop.f32.mrf.mxu0 }
 0x222   : > { %v2258_v52 = vadd.f32 %v3521_v50, %v4564_v3  ;;  %v2275_v57 = vmax.f32 %v2255_v48, 0.0  ;;  %v2358_v42 = vsel %vm2323_vm3, %v2277_v53, 0.0 }
 0x223   : > { %v2196_v56 = vpop.f32.mrf.mxu0 }
 0x224   : > { %v2278_v55 = vmax.f32 %v2258_v52, 0.0  ;;  %v2256_v9 = vadd.f32 %v4564_v3, %v2196_v56  ;;  %2773 = vrot.lane.b32.xlu0 %v2627_v37, %s3719_s29  ;;  %2593 = vrot.lane.b32.xlu1 %v2538_v47, %s3714_s17  ;;  %v2356_v63 = vsel %vm2322_vm11, %v2275_v57, 0.0 }
 0x226   : > { %v2359_v59 = vsel %vm2323_vm3, %v2278_v55, 0.0  ;;  %v2276_v23 = vmax.f32 %v2256_v9, 0.0 }
 0x227   : > { %v2373_v61 = vpack.c.bf16 %v2359_v59, %v2358_v42 }
 0x228   : > { %v2357_v0 = vsel %vm2322_vm11, %v2276_v23, 0.0  ;;  %2647 = vrot.lane.b32.xlu0 %v2627_v37, %s3713_s16 }
 0x229   : > { %v2414_v4 = vshrl.u32 %v2373_v61, 16  ;;  %v2372_v6 = vpack.c.bf16 %v2357_v0, %v2356_v63  ;;  %v2417_v10 = vshll.u32 %v2373_v61, 16 }
 0x22b   : > { %v2416_v8 = vrot.slane %v2414_v4, 7  ;;  %v2407_v11 = vshrl.u32 %v2372_v6, 16  ;;  %v2410_v17 = vshll.u32 %v2372_v6, 16 }
 0x22c   : > { %2692 = vrot.lane.b32.xlu0 %v2538_v47, %s3715_s19 }
 0x22d   : > { %v2419_v20 = vor.u32 %v2417_v10, %v2416_v8  ;;  %v2409_v14 = vrot.slane %v2407_v11, 7  ;;  %v2486_v21 = vsel %vm4573_vm0, %v2416_v8, 0 }
 0x22e   : > { %v2635_v19 = vrot.slane %v2486_v21, 1  ;;  %v2559_v44 = vshll.u32 %v2486_v21, 16 }
 0x22f   : > { %v4674_v15 = vsel %vm4573_vm0, 0, %v2419_v20  ;;  %v2412_v31 = vor.u32 %v2410_v17, %v2409_v14  ;;  %v2485_v58 = vsel %vm4573_vm0, %v2409_v14, 0 }
 0x230   : > { %2668 = vrot.lane.b32.xlu0 %v4674_v15, %s3712_s15  ;;  %2731 = vrot.lane.b32.xlu1 %v4674_v15, %s3717_s27  ;;  %v2634_v25 = vrot.slane %v4674_v15, 1  ;;  %v2554_v39 = vshll.u32 %v4674_v15, 16  ;;  %v2632_v41 = vrot.slane %v2485_v58, 1  ;;  %v2552_v43 = vshrl.u32 %v4674_v15, 16 }
 0x231   : > { %v4687_v22 = vsel %vm4573_vm0, 0, %v2412_v31  ;;  %v2561_v52 = vrot.slane %v2559_v44, 1  ;;  %v2547_v10 = vshll.u32 %v2485_v58, 16 }
 0x232   : > { %v2636_v29 = vsel %vm1283_vm9, %v2634_v25, %v2635_v19  ;;  %v2631_v35 = vrot.slane %v4687_v22, 1  ;;  %v2556_v37 = vrot.slane %v2554_v39, 1  ;;  %v2542_v42 = vshll.u32 %v4687_v22, 16 }
 0x233   : > { %v2540_v8 = vshrl.u32 %v4687_v22, 16  ;;  %v2549_v13 = vrot.slane %v2547_v10, 1  ;;  %v2296_v19 = vadd.s32 8, %v4559_v2 }
 0x234   : > { %2753 = vrot.lane.b32.xlu0 %v2526_v1, %s3718_s28  ;;  %2690 = vrot.lane.b32.xlu1 %v2526_v1, %s3715_s19  ;;  %v2633_v47 = vsel %vm1283_vm9, %v2631_v35, %v2632_v41  ;;  %v2557_v48 = vor.u32 %v2556_v37, %v2552_v43  ;;  %v2544_v4 = vrot.slane %v2542_v42, 1 }
 0x235   : > { %vm2306_vm11 = vcmp.ge.s32.totalorder %v2296_v19, 0  ;;  %vm2316_vm4 = vcmp.lt.s32.totalorder %v2296_v19, 16 }
 0x236   : > { %v2562_v9 = vsel %vm1142_vm10, %v2557_v48, %v2561_v52  ;;  %v2545_v12 = vor.u32 %v2544_v4, %v2540_v8  ;;  %vm2326_vm6 = vmand %vm2306_vm11, %vm2316_vm4 }
 0x238   : > { %2591 = vrot.lane.b32.xlu1 %v2526_v1, %s3714_s17  ;;  %2729 = vrot.lane.b32.xlu0 %v4687_v22, %s3717_s27  ;;  %v2550_v16 = vsel %vm1142_vm10, %v2545_v12, %v2549_v13  ;;  %v2297_v1 = vadd.s32 9, %v4559_v2 }
 0x23a   : > { %vm2307_vm2 = vcmp.ge.s32.totalorder %v2297_v1, 0  ;;  %vm2317_vm3 = vcmp.lt.s32.totalorder %v2297_v1, 16 }
 0x23b   : > { %vm2327_vm5 = vmand %vm2307_vm2, %vm2317_vm3  ;;  %vm4989_vm2 = vcmask 293888  }
 0x23c   : > { %2779 = vrot.lane.b32.xlu0 %v2636_v29, %s3719_s29  ;;  %2666 = vrot.lane.b32.xlu1 %v4687_v22, %s3712_s15  ;;  %vm4992_vm4 = vmmov %vm4989_vm2 }
 0x23d   : > { %v3524_v24 = vpop.f32.mrf.mxu0 }
 0x23e   : > { %v2261_v5 = vadd.f32 %v3524_v24, %v4564_v3 }
 0x23f   : > { %v2209_v34 = vpop.f32.mrf.mxu0 }
 0x240   : > { %v2259_v26 = vadd.f32 %v4564_v3, %v2209_v34  ;;  %2716 = vrot.lane.b32.xlu0 %v2636_v29, %s3716_s26  ;;  %2653 = vrot.lane.b32.xlu1 %v2636_v29, %s3713_s16  ;;  %v2281_v40 = vmax.f32 %v2261_v5, 0.0 }
 0x241   : > { %v3525_v36 = vpop.f32.mrf.mxu0 }
 0x242   : > { %v2262_v45 = vadd.f32 %v3525_v36, %v4564_v3  ;;  %v2279_v51 = vmax.f32 %v2259_v26, 0.0  ;;  %v2362_v54 = vsel %vm2325_vm8, %v2281_v40, 0.0 }
 0x243   : > { %v2212_v46 = vpop.f32.mrf.mxu0 }
 0x244   : > { %v2282_v50 = vmax.f32 %v2262_v45, 0.0  ;;  %v2260_v53 = vadd.f32 %v4564_v3, %v2212_v46  ;;  %2777 = vrot.lane.b32.xlu0 %v2633_v47, %s3719_s29  ;;  %2714 = vrot.lane.b32.xlu1 %v2633_v47, %s3716_s26  ;;  %v2360_v59 = vsel %vm2324_vm1, %v2279_v51, 0.0 }
 0x246   : > { %v2363_v56 = vsel %vm2325_vm8, %v2282_v50, 0.0  ;;  %v2280_v57 = vmax.f32 %v2260_v53, 0.0  ;;  %vm4987_vm8 = vcmask 261120  }
 0x247   : > { %v2375_v55 = vpack.c.bf16 %v2363_v56, %v2362_v54  ;;  %vm4991_vm11 = vmmov %vm4987_vm8 }
 0x248   : > { %v2361_v23 = vsel %vm2324_vm1, %v2280_v57, 0.0  ;;  %2651 = vrot.lane.b32.xlu0 %v2633_v47, %s3713_s16  ;;  %2759 = vrot.lane.b32.xlu1 %v2562_v9, %s3718_s28 }
 0x249   : > { %v2428_v61 = vshrl.u32 %v2375_v55, 16  ;;  %v2374_v60 = vpack.c.bf16 %v2361_v23, %v2360_v59  ;;  %v2431_v63 = vshll.u32 %v2375_v55, 16 }
 0x24b   : > { %v2430_v62 = vrot.slane %v2428_v61, 7  ;;  %v2421_v0 = vshrl.u32 %v2374_v60, 16  ;;  %v2424_v20 = vshll.u32 %v2374_v60, 16 }
 0x24c   : > { %2696 = vrot.lane.b32.xlu0 %v2562_v9, %s3715_s19  ;;  %2597 = vrot.lane.b32.xlu1 %v2562_v9, %s3714_s17 }
 0x24d   : > { %v2433_v6 = vor.u32 %v2431_v63, %v2430_v62  ;;  %v2423_v11 = vrot.slane %v2421_v0, 7  ;;  %v2488_v17 = vsel %vm4573_vm0, %v2430_v62, 0 }
 0x24e   : > { %v2641_v21 = vrot.slane %v2488_v17, 1  ;;  %v2583_v41 = vshll.u32 %v2488_v17, 16 }
 0x24f   : > { %v4722_v49 = vsel %vm4573_vm0, 0, %v2433_v6  ;;  %v2426_v14 = vor.u32 %v2424_v20, %v2423_v11  ;;  %v2487_v58 = vsel %vm4573_vm0, %v2423_v11, 0 }
 0x250   : > { %2672 = vrot.lane.b32.xlu0 %v4722_v49, %s3712_s15  ;;  %2735 = vrot.lane.b32.xlu1 %v4722_v49, %s3717_s27  ;;  %v2640_v31 = vrot.slane %v4722_v49, 1  ;;  %v2578_v30 = vshll.u32 %v4722_v49, 16  ;;  %v2638_v36 = vrot.slane %v2487_v58, 1  ;;  %v2576_v45 = vshrl.u32 %v4722_v49, 16 }
 0x251   : > { %v4735_v18 = vsel %vm4573_vm0, 0, %v2426_v14  ;;  %v2571_v62 = vshll.u32 %v2487_v58, 16 }
 0x252   : > { %v2642_v39 = vsel %vm1283_vm9, %v2640_v31, %v2641_v21  ;;  %v2637_v33 = vrot.slane %v4735_v18, 1  ;;  %v2580_v37 = vrot.slane %v2578_v30, 1  ;;  %v2566_v47 = vshll.u32 %v4735_v18, 16 }
 0x253   : > { %v2564_v60 = vshrl.u32 %v4735_v18, 16  ;;  %v2573_v11 = vrot.slane %v2571_v62, 1 }
 0x254   : > { %2757 = vrot.lane.b32.xlu0 %v2550_v16, %s3718_s28  ;;  %2694 = vrot.lane.b32.xlu1 %v2550_v16, %s3715_s19  ;;  %v2639_v46 = vsel %vm1283_vm9, %v2637_v33, %v2638_v36  ;;  %v2581_v53 = vor.u32 %v2580_v37, %v2576_v45  ;;  %v2568_v42 = vrot.slane %v2566_v47, 1 }
 0x256   : > { %v2569_v4 = vor.u32 %v2568_v42, %v2564_v60 }
 0x258   : > { %2595 = vrot.lane.b32.xlu1 %v2550_v16, %s3714_s17  ;;  %2733 = vrot.lane.b32.xlu0 %v4735_v18, %s3717_s27  ;;  %v2574_v13 = vsel %vm1142_vm10, %v2569_v4, %v2573_v11 }
 0x25a   : > { %v3528_v25 = vpop.f32.mrf.mxu0 }
 0x25b   : > { %v2265_v29 = vadd.f32 %v3528_v25, %v4564_v3 }
 0x25c   : > { %2783 = vrot.lane.b32.xlu0 %v2642_v39, %s3719_s29  ;;  %2670 = vrot.lane.b32.xlu1 %v4735_v18, %s3712_s15  ;;  %v2225_v24 = vpop.f32.mrf.mxu0 }
 0x25d   : > { %v2263_v5 = vadd.f32 %v4564_v3, %v2225_v24  ;;  %v2285_v34 = vmax.f32 %v2265_v29, 0.0 }
 0x25e   : > { %v3529_v2 = vpop.f32.mrf.mxu0 }
 0x25f   : > { %v2266_v35 = vadd.f32 %v3529_v2, %v4564_v3  ;;  %v2283_v43 = vmax.f32 %v2263_v5, 0.0  ;;  %v2366_v48 = vsel %vm2327_vm5, %v2285_v34, 0.0 }
 0x260   : > { %2720 = vrot.lane.b32.xlu0 %v2642_v39, %s3716_s26  ;;  %2657 = vrot.lane.b32.xlu1 %v2642_v39, %s3713_s16  ;;  %v2228_v26 = vpop.f32.mrf.mxu0 }
 0x261   : > { %v2286_v44 = vmax.f32 %v2266_v35, 0.0  ;;  %v2264_v40 = vadd.f32 %v4564_v3, %v2228_v26  ;;  %v2364_v54 = vsel %vm2326_vm6, %v2283_v43, 0.0  ;;  %v2585_v3 = vrot.slane %v2583_v41, 1 }
 0x262   : > { %v2661_v8 = vpop.permute.xlu0 %2660 }
 0x263   : > { %v2367_v51 = vsel %vm2327_vm5, %v2286_v44, 0.0  ;;  %v2284_v50 = vmax.f32 %v2264_v40, 0.0  ;;  %v2586_v9 = vsel %vm1142_vm10, %v2581_v53, %v2585_v3 }
 0x264   : > { %v2377_v52 = vpack.c.bf16 %v2367_v51, %v2366_v48  ;;  %2781 = vrot.lane.b32.xlu0 %v2639_v46, %s3719_s29  ;;  %2718 = vrot.lane.b32.xlu1 %v2639_v46, %s3716_s26 }
 0x265   : > { %v2365_v56 = vsel %vm2326_vm6, %v2284_v50, 0.0  ;;  %v2646_v24 = vpop.permute.xlu1 %2645 }
 0x266   : > { %v2442_v57 = vshrl.u32 %v2377_v52, 16  ;;  %v2376_v55 = vpack.c.bf16 %v2365_v56, %v2364_v54  ;;  %v2445_v61 = vshll.u32 %v2377_v52, 16  ;;  %v2709_v21 = vpop.permute.xlu0 %2708 }
 0x268   : > { %v2444_v59 = vrot.slane %v2442_v57, 7  ;;  %v2435_v23 = vshrl.u32 %v2376_v55, 16  ;;  %2655 = vrot.lane.b32.xlu0 %v2639_v46, %s3713_s16  ;;  %2763 = vrot.lane.b32.xlu1 %v2586_v9, %s3718_s28  ;;  %v2438_v0 = vshll.u32 %v2376_v55, 16 }
 0x269   : > { %v2590_v26 = vpop.permute.xlu1 %2589 }
 0x26a   : > { %v2437_v63 = vrot.slane %v2435_v23, 7  ;;  %v2447_v6 = vor.u32 %v2445_v61, %v2444_v59  ;;  %v2644_v58 = vpop.permute.xlu0 %2643  ;;  %v2490_v2 = vsel %vm4573_vm0, %v2444_v59, 0  ;;  %v2792_v62 = vsel %vm1914_vm12, %v4581_v32, %v2590_v26 }
 0x26b   : > { %v2749_v37 = vshll.u32 %v2490_v2, 16  ;;  %v2771_v48 = vrot.slane %v2490_v2, 1 }
 0x26c   : > { %2700 = vrot.lane.b32.xlu0 %v2586_v9, %s3715_s19  ;;  %2601 = vrot.lane.b32.xlu1 %v2586_v9, %s3714_s17  ;;  %v2440_v10 = vor.u32 %v2438_v0, %v2437_v63  ;;  %v2489_v12 = vsel %vm4573_vm0, %v2437_v63, 0  ;;  %v2480_v14 = vsel %vm4573_vm0, 0, %v2447_v6  ;;  %v2808_v6 = vsel %vm1935_vm13, %v2792_v62, %v2646_v24 }
 0x26d   : > { %v2684_v1 = vshll.u32 %v2489_v12, 16  ;;  %v2744_v29 = vshll.u32 %v2480_v14, 16  ;;  %v2706_v5 = vrot.slane %v2489_v12, 1  ;;  %v2742_v35 = vshrl.u32 %v2480_v14, 16 }
 0x26e   : > { %v2479_v20 = vsel %vm4573_vm0, 0, %v2440_v10  ;;  %v2689_v36 = vpop.permute.xlu0 %2688  ;;  %v2751_v43 = vrot.slane %v2749_v37, 1  ;;  %v2770_v47 = vrot.slane %v2480_v14, 1  ;;  %vm4985_vm0 = vcmask 228352  }
 0x26f   : > { %v2679_v16 = vshll.u32 %v2479_v20, 16  ;;  %v2677_v17 = vshrl.u32 %v2479_v20, 16  ;;  %v2686_v19 = vrot.slane %v2684_v1, 1  ;;  %v2705_v30 = vrot.slane %v2479_v20, 1  ;;  %vm4990_vm3 = vmmov %vm4985_vm0 }
 0x270   : > { %2761 = vrot.lane.b32.xlu0 %v2574_v13, %s3718_s28  ;;  %2739 = vrot.lane.b32.xlu1 %v2480_v14, %s3717_s27  ;;  %v2746_v33 = vrot.slane %v2744_v29, 1  ;;  %v2772_v50 = vsel %vm1283_vm9, %v2770_v47, %v2771_v48 }
 0x271   : > { %v2681_v31 = vrot.slane %v2679_v16, 1  ;;  %v2707_v34 = vsel %vm1283_vm9, %v2705_v30, %v2706_v5  ;;  %vm4983_vm9 = vcmask 162816  }
 0x272   : > { %v2747_v41 = vor.u32 %v2746_v33, %v2742_v35  ;;  %vm4986_vm7 = vmmov %vm4983_vm9 }
 0x273   : > { %v2682_v25 = vor.u32 %v2681_v31, %v2677_v17  ;;  %vm4993_vm5 = vmmov %vm4986_vm7 }
 0x274   : > { %2698 = vrot.lane.b32.xlu1 %v2574_v13, %s3715_s19  ;;  %2737 = vrot.lane.b32.xlu0 %v2479_v20, %s3717_s27  ;;  %v2752_v27 = vsel %vm1142_vm10, %v2747_v41, %v2751_v43 }
 0x275   : > { %v2687_v39 = vsel %vm1142_vm10, %v2682_v25, %v2686_v19  ;;  %vm4984_vm10 = vcmask 195584  }
 0x276   : > { %vm4988_vm1 = vmmov %vm4984_vm10 }
 0x277   : > { %vm4994_vm6 = vmmov %vm4988_vm1 }
 0x278   : > { %2599 = vrot.lane.b32.xlu1 %v2574_v13, %s3714_s17  ;;  %2765 = vrot.lane.b32.xlu0 %v2687_v39, %s3718_s28 }
 0x27c   : > { %2674 = vrot.lane.b32.xlu1 %v2479_v20, %s3712_s15  ;;  %2785 = vrot.lane.b32.xlu0 %v2707_v34, %s3719_s29  ;;  %s3479_s15 = sshll.u32 %s3693_s18, 7 }
 0x27d   : > { %s4876_s16 = scalar_lea.vmem %s3790_s6, %s3479_s15 }
 0x280   : > { %2722 = vrot.lane.b32.xlu1 %v2707_v34, %s3716_s26 }
 0x282   : > { %v2728_v44 = vpop.permute.xlu1 %2727  ;;  %v2665_v40 = vpop.permute.xlu0 %2664 }
 0x284   : > { %2767 = vrot.lane.b32.xlu1 %v2752_v27, %s3718_s28 }
 0x286   : > { %v2663_v45 = vpop.permute.xlu1 %2662  ;;  %v2588_v46 = vpop.permute.xlu0 %2587 }
 0x287   : > { %v2790_v57 = vsel %vm1914_vm12, %v4589_v38, %v2588_v46  ;;  %v2824_v38 = vsel %vm1956_vm14, %v2808_v6, %v2663_v45 }
 0x288   : > { %2702 = vrot.lane.b32.xlu1 %v2687_v39, %s3715_s19  ;;  %v2806_v9 = vsel %vm1935_vm13, %v2790_v57, %v2644_v58 }
 0x289   : > { %v2822_v59 = vsel %vm1956_vm14, %v2806_v9, %v2661_v8 }
 0x28a   : > { %v2726_v51 = vpop.permute.xlu0 %2725  ;;  %v2650_v53 = vpop.permute.xlu1 %2649  ;;  %v2838_v60 = vsel %vm1977_vm15, %v2822_v59, %v2689_v36 }
 0x28b   : > { %v2854_v4 = vsel %vm4983_vm9, %v2838_v60, %v2709_v21  ;;  %vm4995_vm9 = vmmov %vm4985_vm0 }
 0x28c   : > { %2787 = vrot.lane.b32.xlu1 %v2772_v50, %s3719_s29  ;;  %v2870_v10 = vsel %vm4984_vm10, %v2854_v4, %v2726_v51  ;;  %vm4996_vm10 = vmmov %vm4993_vm5 }
 0x28e   : > { %v2776_v52 = vpop.permute.xlu0 %2775  ;;  %v2711_v54 = vpop.permute.xlu1 %2710 }
 0x292   : > { %v2713_v56 = vpop.permute.xlu0 %2712  ;;  %v2756_v55 = vpop.permute.xlu1 %2755 }
 0x296   : > { %v2774_v3 = vpop.permute.xlu0 %2773  ;;  %v2594_v23 = vpop.permute.xlu1 %2593 }
 0x297   : > { %v2796_v26 = vsel %vm1914_vm12, %v4613_v7, %v2594_v23 }
 0x29a   : > { %v2648_v42 = vpop.permute.xlu0 %2647 }
 0x29e   : > { %v2693_v61 = vpop.permute.xlu0 %2692 }
 0x2a2   : > { %v2732_v63 = vpop.permute.xlu1 %2731  ;;  %v2669_v0 = vpop.permute.xlu0 %2668 }
 0x2a6   : > { %v2691_v11 = vpop.permute.xlu1 %2690  ;;  %v2754_v12 = vpop.permute.xlu0 %2753 }
 0x2a7   : > { %v2840_v8 = vsel %vm1977_vm15, %v2824_v38, %v2691_v11  ;;  %v2886_v20 = vsel %vm4985_vm0, %v2870_v10, %v2754_v12  ;;  %vm4997_vm0 = vmmov %vm4987_vm8 }
 0x2a8   : > { %v2856_v13 = vsel %vm4986_vm7, %v2840_v8, %v2711_v54  ;;  %v2902_v32 = vsel %vm4987_vm8, %v2886_v20, %v2774_v3  ;;  %vm4998_vm7 = vmmov %vm4988_vm1 }
 0x2a9   : > { %v2872_v14 = vsel %vm4988_vm1, %v2856_v13, %v2728_v44  ;;  %3536 = vmatprep.mubr.msk.bf16.mxu1 %vm4989_vm2, %v2902_v32  ;;  %v2812_v44 = vsel %vm1935_vm13, %v2796_v26, %v2650_v53  ;;  %vm4999_vm8 = vmmov %vm4989_vm2 }
 0x2aa   : > { %v2592_v16 = vpop.permute.xlu1 %2591  ;;  %v2730_v17 = vpop.permute.xlu0 %2729  ;;  %v2888_v31 = vsel %vm4990_vm3, %v2872_v14, %v2756_v55  ;;  %vm5000_vm1 = vmmov %vm4990_vm3 }
 0x2ab   : > { %v2904_v1 = vsel %vm4991_vm11, %v2888_v31, %v2776_v52  ;;  %v2794_v24 = vsel %vm1914_vm12, %v4624_v28, %v2592_v16  ;;  %vm5001_vm2 = vmmov %vm4997_vm0 }
 0x2ac   : > { %3537 = vmatmul.mubr.msk.bf16.vlgmr.msra.gmra.mxu1 %vm4992_vm4, %v2904_v1  ;;  %v2810_v58 = vsel %vm1935_vm13, %v2794_v24, %v2648_v42  ;;  %vm5002_vm3 = vmmov %vm4992_vm4 }
 0x2ad   : > { %v2826_v33 = vsel %vm1956_vm14, %v2810_v58, %v2665_v40  ;;  %vm5003_vm11 = vmmov %vm4993_vm5 }
 0x2ae   : > { %v2667_v21 = vpop.permute.xlu1 %2666  ;;  %v2780_v25 = vpop.permute.xlu0 %2779  ;;  %v2842_v37 = vsel %vm1977_vm15, %v2826_v33, %v2693_v61  ;;  %vm5004_vm4 = vmmov %vm4994_vm6 }
 0x2af   : > { %v2858_v43 = vsel %vm4993_vm5, %v2842_v37, %v2713_v56  ;;  %v2828_v27 = vsel %vm1956_vm14, %v2812_v44, %v2667_v21  ;;  %vm5005_vm5 = vmmov %vm5000_vm1 }
 0x2b0   : > { %v2874_v28 = vsel %vm4994_vm6, %v2858_v43, %v2730_v17  ;;  %vm5006_vm6 = vmmov %vm4997_vm0 }
 0x2b2   : > { %v2654_v19 = vpop.permute.xlu1 %2653  ;;  %v2717_v29 = vpop.permute.xlu0 %2716 }
 0x2b6   : > { %v2715_v39 = vpop.permute.xlu1 %2714  ;;  %v2778_v30 = vpop.permute.xlu0 %2777 }
 0x2ba   : > { %v2760_v5 = vpop.permute.xlu1 %2759  ;;  %v2652_v2 = vpop.permute.xlu0 %2651 }
 0x2be   : > { %v2598_v34 = vpop.permute.xlu1 %2597  ;;  %v2697_v35 = vpop.permute.xlu0 %2696 }
 0x2bf   : > { %v2800_v10 = vsel %vm1914_vm12, %v4674_v15, %v2598_v34 }
 0x2c2   : > { %v2736_v36 = vpop.permute.xlu1 %2735  ;;  %v2673_v41 = vpop.permute.xlu0 %2672 }
 0x2c6   : > { %v2695_v45 = vpop.permute.xlu1 %2694  ;;  %v2758_v46 = vpop.permute.xlu0 %2757 }
 0x2c7   : > { %v2844_v40 = vsel %vm1977_vm15, %v2828_v27, %v2695_v45  ;;  %v2890_v47 = vsel %vm4995_vm9, %v2874_v28, %v2758_v46  ;;  %vm5007_vm9 = vmmov %vm5002_vm3 }
 0x2c8   : > { %v2860_v48 = vsel %vm4996_vm10, %v2844_v40, %v2715_v39  ;;  %v2906_v7 = vsel %vm4997_vm0, %v2890_v47, %v2778_v30  ;;  %vm5008_vm0 = vmmov %vm5004_vm4  ;;  %v3080_v47 = vld [vmem:[%s4876_s16 + $0x10] sm:$0xff] }
 0x2c9   : > { %v2876_v51 = vsel %vm4998_vm7, %v2860_v48, %v2732_v63  ;;  %3540 = vmatprep.mubr.msk.bf16.mxu1 %vm4999_vm8, %v2906_v7  ;;  %vm5009_vm7 = vmmov %vm5000_vm1 }
 0x2ca   : > { %v2596_v50 = vpop.permute.xlu1 %2595  ;;  %v2734_v53 = vpop.permute.xlu0 %2733  ;;  %v2892_v52 = vsel %vm5000_vm1, %v2876_v51, %v2760_v5  ;;  %vm5010_vm8 = vmmov %vm5001_vm2  ;;  %v3078_v51 = vld [vmem:[%s4876_s16] sm:$0xff] }
 0x2cb   : > { %v2908_v54 = vsel %vm5001_vm2, %v2892_v52, %v2780_v25  ;;  %v2798_v9 = vsel %vm1914_vm12, %v4687_v22, %v2596_v50  ;;  %vm5011_vm1 = vmmov %vm5002_vm3 }
 0x2cc   : > { %3541 = vmatmul.mubr.msk.bf16.gmra.mxu1 %vm5002_vm3, %v2908_v54  ;;  %v2814_v42 = vsel %vm1935_vm13, %v2798_v9, %v2652_v2  ;;  %vm5012_vm2 = vmmov %vm4996_vm10  ;;  %v3081_v54 = vld [vmem:[%s4876_s16 + $0x18] sm:$0xff]  ;;  %v3079_v9 = vld [vmem:[%s4876_s16 + $0x8] sm:$0xff] }
 0x2cd   : > { %v2830_v61 = vsel %vm1956_vm14, %v2814_v42, %v2669_v0  ;;  %v2816_v0 = vsel %vm1935_vm13, %v2800_v10, %v2654_v19  ;;  %vm5013_vm3 = vmmov %vm5008_vm0  ;;  %v3082_v10 = vld [vmem:[%s4876_s16 + $0x20] sm:$0xff] }
 0x2ce   : > { %v2671_v56 = vpop.permute.xlu1 %2670  ;;  %v2784_v3 = vpop.permute.xlu0 %2783  ;;  %v2846_v63 = vsel %vm1977_vm15, %v2830_v61, %v2697_v35 }
 0x2cf   : > { %v2862_v38 = vsel %vm5003_vm11, %v2846_v63, %v2717_v29  ;;  %v2832_v13 = vsel %vm1956_vm14, %v2816_v0, %v2671_v56  ;;  %vm5014_vm11 = vmmov %vm5005_vm5 }
 0x2d0   : > { %v2878_v11 = vsel %vm5004_vm4, %v2862_v38, %v2734_v53  ;;  %vm5015_vm4 = vmmov %vm5006_vm6 }
 0x2d2   : > { %v2658_v57 = vpop.permute.xlu1 %2657  ;;  %v2721_v55 = vpop.permute.xlu0 %2720 }
 0x2d6   : > { %v2719_v59 = vpop.permute.xlu1 %2718  ;;  %v2782_v23 = vpop.permute.xlu0 %2781 }
 0x2da   : > { %v2764_v60 = vpop.permute.xlu1 %2763  ;;  %v2656_v62 = vpop.permute.xlu0 %2655 }
 0x2de   : > { %v2602_v4 = vpop.permute.xlu1 %2601  ;;  %v2701_v6 = vpop.permute.xlu0 %2700 }
 0x2df   : > { %v2804_v35 = vsel %vm1914_vm12, %v4722_v49, %v2602_v4  ;;  %v4881_v49 = vld [vmem:[%s4966_s4] ss:$0 sm:$0xff]  ;;  %v3084_v4 = vld [vmem:[%s4876_s16 + $0x30] sm:$0xff] }
 0x2e0   : > { %v2820_v26 = vsel %vm1935_vm13, %v2804_v35, %v2658_v57 }
 0x2e2   : > { %v2740_v22 = vpop.permute.xlu1 %2739  ;;  %v2762_v12 = vpop.permute.xlu0 %2761 }
 0x2e3   : > { %v2894_v8 = vsel %vm5005_vm5, %v2878_v11, %v2762_v12  ;;  %vm5016_vm5 = vmmov %vm5011_vm1 }
 0x2e4   : > { %v2910_v20 = vsel %vm5006_vm6, %v2894_v8, %v2782_v23  ;;  %vm5017_vm6 = vmmov %vm5012_vm2  ;;  %v3085_v8 = vld [vmem:[%s4876_s16 + $0x38] sm:$0xff] }
 0x2e5   : > { %3544 = vmatprep.mubr.msk.bf16.mxu1 %vm5007_vm9, %v2910_v20  ;;  %vm5018_vm9 = vmmov %vm5008_vm0 }
 0x2e6   : > { %v2699_v32 = vpop.permute.xlu1 %2698  ;;  %v2738_v14 = vpop.permute.xlu0 %2737 }
 0x2e7   : > { %v2848_v16 = vsel %vm1977_vm15, %v2832_v13, %v2699_v32 }
 0x2e8   : > { %v2864_v15 = vsel %vm4996_vm10, %v2848_v16, %v2719_v59  ;;  %vm5019_vm10 = vmmov %vm5009_vm7 }
 0x2e9   : > { %v2880_v17 = vsel %vm5008_vm0, %v2864_v15, %v2736_v36  ;;  %vm5020_vm0 = vmmov %vm5015_vm4 }
 0x2ea   : > { %v2600_v31 = vpop.permute.xlu1 %2599  ;;  %v2896_v1 = vsel %vm5009_vm7, %v2880_v17, %v2764_v60  ;;  %v2766_v25 = vpop.permute.xlu0 %2765  ;;  %vm5021_vm7 = vmmov %vm5011_vm1 }
 0x2eb   : > { %v2802_v21 = vsel %vm1914_vm12, %v4735_v18, %v2600_v31  ;;  %v2912_v19 = vsel %vm5010_vm8, %v2896_v1, %v2784_v3 }
 0x2ec   : > { %v2818_v29 = vsel %vm1935_vm13, %v2802_v21, %v2656_v62  ;;  %3545 = vmatmul.mubr.msk.bf16.gmra.mxu1 %vm5011_vm1, %v2912_v19  ;;  %v3088_v19 = vld [vmem:[%s4876_s16 + $0x50] sm:$0xff] }
 0x2ed   : > { %v2834_v39 = vsel %vm1956_vm14, %v2818_v29, %v2673_v41 }
 0x2ee   : > { %v2850_v30 = vsel %vm1977_vm15, %v2834_v39, %v2701_v6  ;;  %v2675_v24 = vpop.permute.xlu1 %2674  ;;  %v2786_v33 = vpop.permute.xlu0 %2785 }
 0x2ef   : > { %v2866_v58 = vsel %vm5012_vm2, %v2850_v30, %v2721_v55  ;;  %v2836_v36 = vsel %vm1956_vm14, %v2820_v26, %v2675_v24  ;;  %v3086_v30 = vld [vmem:[%s4876_s16 + $0x40] sm:$0xff] }
 0x2f0   : > { %v2882_v5 = vsel %vm5013_vm3, %v2866_v58, %v2738_v14  ;;  %v3083_v14 = vld [vmem:[%s4876_s16 + $0x28] sm:$0xff] }
 0x2f1   : > { %v2898_v2 = vsel %vm5014_vm11, %v2882_v5, %v2766_v25 }
 0x2f2   : > { %v2914_v18 = vsel %vm5015_vm4, %v2898_v2, %v2786_v33  ;;  %v2723_v34 = vpop.permute.xlu1 %2722  ;;  %v3089_v2 = vld [vmem:[%s4876_s16 + $0x58] sm:$0xff] }
 0x2f3   : > { %3548 = vmatprep.mubr.msk.bf16.mxu1 %vm5016_vm5, %v2914_v18 }
 0x2f6   : > { %v2768_v37 = vpop.permute.xlu1 %2767 }
 0x2fa   : > { %v2703_v41 = vpop.permute.xlu1 %2702 }
 0x2fb   : > { %v2852_v43 = vsel %vm1977_vm15, %v2836_v36, %v2703_v41 }
 0x2fc   : > { %v2868_v44 = vsel %vm5017_vm6, %v2852_v43, %v2723_v34 }
 0x2fd   : > { %v2884_v28 = vsel %vm5018_vm9, %v2868_v44, %v2740_v22 }
 0x2fe   : > { %v2900_v27 = vsel %vm5019_vm10, %v2884_v28, %v2768_v37  ;;  %v2788_v45 = vpop.permute.xlu1 %2787  ;;  %v3087_v37 = vld [vmem:[%s4876_s16 + $0x48] sm:$0xff] }
 0x2ff   : > { %v2916_v46 = vsel %vm5020_vm0, %v2900_v27, %v2788_v45  ;;  %v3092_v45 = vld [vmem:[%s4876_s16 + $0x70] sm:$0xff] }
 0x300   : > { %3549 = vmatmul.mubr.msk.bf16.gmra.mxu1 %vm5021_vm7, %v2916_v46 }
 0x36c   : > { %v3538_v40 = vpop.f32.mrf.mxu1 }
 0x36d   : > { %v3062_v48 = vadd.f32 %v3538_v40, %v4881_v49 }
 0x36e   : > { %v2990_v7 = vpop.f32.mrf.mxu1 }
 0x36f   : > { %v3096_v50 = vadd.f32 %v3080_v47, %v3062_v48  ;;  %v3060_v53 = vadd.f32 %v4881_v49, %v2990_v7  ;;  %v3090_v47 = vld [vmem:[%s4876_s16 + $0x60] sm:$0xff] }
 0x370   : > { %v3539_v52 = vpop.f32.mrf.mxu1 }
 0x371   : > { %v3112_v56 = vmax.f32 %v3096_v50, 0.0  ;;  %v3094_v3 = vadd.f32 %v3078_v51, %v3060_v53  ;;  %v3063_v57 = vadd.f32 %v3539_v52, %v4881_v49  ;;  %v3093_v50 = vld [vmem:[%s4876_s16 + $0x78] sm:$0xff] }
 0x372   : > { %v2993_v55 = vpop.f32.mrf.mxu1 }
 0x373   : > { %3128 = vst.msk [vmem:[%s3795_s12 + $0x10] sm:$0xff] %vm1914_vm12, %v3112_v56  ;;  %v3110_v42 = vmax.f32 %v3094_v3, 0.0  ;;  %v3097_v59 = vadd.f32 %v3081_v54, %v3063_v57  ;;  %v3061_v23 = vadd.f32 %v4881_v49, %v2993_v55  ;;  %v3091_v3 = vld [vmem:[%s4876_s16 + $0x68] sm:$0xff] }
 0x375   : > { %3126 = vst.msk [vmem:[%s3795_s12] sm:$0xff] %vm1914_vm12, %v3110_v42  ;;  %v3113_v61 = vmax.f32 %v3097_v59, 0.0  ;;  %v3095_v60 = vadd.f32 %v3079_v9, %v3061_v23 }
 0x377   : > { %3129 = vst.msk [vmem:[%s3795_s12 + $0x18] sm:$0xff] %vm1914_vm12, %v3113_v61  ;;  %v3111_v62 = vmax.f32 %v3095_v60, 0.0 }
 0x379   : > { %3127 = vst.msk [vmem:[%s3795_s12 + $0x8] sm:$0xff] %vm1914_vm12, %v3111_v62 }
 0x38c   : > { %v3542_v63 = vpop.f32.mrf.mxu1 }
 0x38d   : > { %v3066_v6 = vadd.f32 %v3542_v63, %v4881_v49 }
 0x38e   : > { %v3006_v38 = vpop.f32.mrf.mxu1 }
 0x38f   : > { %v3100_v11 = vadd.f32 %v3084_v4, %v3066_v6  ;;  %v3064_v22 = vadd.f32 %v4881_v49, %v3006_v38 }
 0x390   : > { %v3543_v12 = vpop.f32.mrf.mxu1 }
 0x391   : > { %v3116_v20 = vmax.f32 %v3100_v11, 0.0  ;;  %v3098_v0 = vadd.f32 %v3082_v10, %v3064_v22  ;;  %v3067_v13 = vadd.f32 %v3543_v12, %v4881_v49 }
 0x392   : > { %v3009_v32 = vpop.f32.mrf.mxu1 }
 0x393   : > { %3132 = vst.msk [vmem:[%s3795_s12 + $0x30] sm:$0xff] %vm1914_vm12, %v3116_v20  ;;  %v3114_v16 = vmax.f32 %v3098_v0, 0.0  ;;  %v3101_v15 = vadd.f32 %v3085_v8, %v3067_v13  ;;  %v3065_v17 = vadd.f32 %v4881_v49, %v3009_v32 }
 0x395   : > { %3130 = vst.msk [vmem:[%s3795_s12 + $0x20] sm:$0xff] %vm1914_vm12, %v3114_v16  ;;  %v3117_v31 = vmax.f32 %v3101_v15, 0.0  ;;  %v3099_v1 = vadd.f32 %v3083_v14, %v3065_v17 }
 0x397   : > { %3133 = vst.msk [vmem:[%s3795_s12 + $0x38] sm:$0xff] %vm1914_vm12, %v3117_v31  ;;  %v3115_v21 = vmax.f32 %v3099_v1, 0.0 }
 0x399   : > { %3131 = vst.msk [vmem:[%s3795_s12 + $0x28] sm:$0xff] %vm1914_vm12, %v3115_v21 }
 0x3ac   : > { %v3546_v25 = vpop.f32.mrf.mxu1 }
 0x3ad   : > { %v3070_v29 = vadd.f32 %v3546_v25, %v4881_v49 }
 0x3ae   : > { %v3022_v39 = vpop.f32.mrf.mxu1 }
 0x3af   : > { %v3104_v24 = vadd.f32 %v3088_v19, %v3070_v29  ;;  %v3068_v58 = vadd.f32 %v4881_v49, %v3022_v39 }
 0x3b0   : > { %v3547_v5 = vpop.f32.mrf.mxu1 }
 0x3b1   : > { %v3120_v33 = vmax.f32 %v3104_v24, 0.0  ;;  %v3102_v18 = vadd.f32 %v3086_v30, %v3068_v58  ;;  %v3071_v34 = vadd.f32 %v3547_v5, %v4881_v49 }
 0x3b2   : > { %v3025_v35 = vpop.f32.mrf.mxu1 }
 0x3b3   : > { %3136 = vst.msk [vmem:[%s3795_s12 + $0x50] sm:$0xff] %vm1914_vm12, %v3120_v33  ;;  %v3118_v26 = vmax.f32 %v3102_v18, 0.0  ;;  %v3105_v36 = vadd.f32 %v3089_v2, %v3071_v34  ;;  %v3069_v41 = vadd.f32 %v4881_v49, %v3025_v35 }
 0x3b5   : > { %3134 = vst.msk [vmem:[%s3795_s12 + $0x40] sm:$0xff] %vm1914_vm12, %v3118_v26  ;;  %v3121_v43 = vmax.f32 %v3105_v36, 0.0  ;;  %v3103_v44 = vadd.f32 %v3087_v37, %v3069_v41 }
 0x3b7   : > { %3137 = vst.msk [vmem:[%s3795_s12 + $0x58] sm:$0xff] %vm1914_vm12, %v3121_v43  ;;  %v3119_v28 = vmax.f32 %v3103_v44, 0.0 }
 0x3b9   : > { %3135 = vst.msk [vmem:[%s3795_s12 + $0x48] sm:$0xff] %vm1914_vm12, %v3119_v28 }
 0x3c0   : > { %v3550_v27 = vpop.f32.mrf.mxu1 }
 0x3c1   : > { %v3074_v46 = vadd.f32 %v3550_v27, %v4881_v49 }
 0x3c2   : > { %v3038_v40 = vpop.f32.mrf.mxu1 }
 0x3c3   : > { %v3108_v48 = vadd.f32 %v3092_v45, %v3074_v46  ;;  %v3072_v7 = vadd.f32 %v4881_v49, %v3038_v40 }
 0x3c4   : > { %v3551_v51 = vpop.f32.mrf.mxu1 }
 0x3c5   : > { %v3124_v53 = vmax.f32 %v3108_v48, 0.0  ;;  %v3106_v52 = vadd.f32 %v3090_v47, %v3072_v7  ;;  %v3075_v54 = vadd.f32 %v3551_v51, %v4881_v49 }
 0x3c6   : > { %v3041_v56 = vpop.f32.mrf.mxu1 }
 0x3c7   : > { %3140 = vst.msk [vmem:[%s3795_s12 + $0x70] sm:$0xff] %vm1914_vm12, %v3124_v53  ;;  %v3122_v57 = vmax.f32 %v3106_v52, 0.0  ;;  %v3109_v55 = vadd.f32 %v3093_v50, %v3075_v54  ;;  %v3073_v9 = vadd.f32 %v4881_v49, %v3041_v56 }
 0x3c9   : > { %3138 = vst.msk [vmem:[%s3795_s12 + $0x60] sm:$0xff] %vm1914_vm12, %v3122_v57  ;;  %v3125_v42 = vmax.f32 %v3109_v55, 0.0  ;;  %v3107_v59 = vadd.f32 %v3091_v3, %v3073_v9 }
 0x3cb   : > { %3141 = vst.msk [vmem:[%s3795_s12 + $0x78] sm:$0xff] %vm1914_vm12, %v3125_v42  ;;  %v3123_v23 = vmax.f32 %v3107_v59, 0.0 }
 0x3cd   : > { %3139 = vst.msk [vmem:[%s3795_s12 + $0x68] sm:$0xff] %vm1914_vm12, %v3123_v23 }
 0x3ce PF: > { %s15_s22 = sadd.s32 1, %s3709_s22   ;;  %s5022_s18 = smov %s3701_s20 }
 0x3cf   : > { %p12_p8 = scmp.ge.s32.totalorder %s15_s22, 6   ;;  %s5023_s19 = smov %s3705_s21 }
 0x3d0   : > { %s5024_s20 = smov %s5027_s23  ;;  %s5025_s21 = smov %s5031_s24 }
 0x3d1   :  { %14 = sbr.rel (!%p12_p8) target bundleno = 3 (0x3), region = 80 }

</bundles_post_ra>
